<compile_context>
chip_gen: v5e
topology: v5e:2x2
jax: 0.10.0
libtpu: 0.0.40
codegen_flags: <defaults>
</compile_context>

<pallas_src>
import jax
import jax.numpy as jnp
from jax.experimental import pallas as pl
from jax.experimental.pallas import tpu as pltpu


def _round_up(x, m):
    return ((x + m - 1) // m) * m


def policy_kernel(x_ref, w1_ref, b1_ref, w2_ref, b2_ref, w3_ref, b3_ref, out_ref):
    # ---- fc1 + relu on the VPU ------------------------------------------
    # K = state_dim (4) is far too small to feed the MXU usefully; unrolled
    # column-broadcast mul-adds run in otherwise-slack VALU slots and avoid an
    # MXU push + result-FIFO pop on the critical path (f32 throughout).
    x = x_ref[...]                                   # [TB, S] f32
    w1 = w1_ref[...]                                 # [S, 128] f32
    h1 = b1_ref[...]                                 # [1, 128] f32 (broadcasts)
    for k in range(w1.shape[0]):                     # S is static & tiny (4)
        h1 = h1 + x[:, k:k + 1] * w1[k:k + 1, :]     # [TB,1]*[1,128] -> [TB,128]
    h1 = jnp.maximum(h1, 0.0)                        # [TB, 128] f32

    # ---- fc2 + relu on the MXU (bf16 inputs, f32 accumulate) -------------
    h2 = jnp.dot(h1.astype(jnp.bfloat16), w2_ref[...],
                 preferred_element_type=jnp.float32) + b2_ref[...]
    h2 = jnp.maximum(h2, 0.0)                        # [TB, 128] f32

    # ---- fc3: lane-dense padded logits; padded lanes carry a -1e30 bias --
    logits = jnp.dot(h2.astype(jnp.bfloat16), w3_ref[...],
                     preferred_element_type=jnp.float32) + b3_ref[...]

    # Numerically-stable softmax over the padded lane dim (padded lanes -> 0).
    # Exact divide so probs sum to 1 (feeds categorical sampling downstream).
    m = jnp.max(logits, axis=-1, keepdims=True)
    e = jnp.exp(logits - m)
    denom = jnp.sum(e, axis=-1, keepdims=True)
    out_ref[...] = (e / denom).astype(out_ref.dtype)  # bf16 store, unmasked vst


def _default_tb(B):
    """Pick a batch tile: few grid steps, but >=2 steps when the batch is big
    enough so both v7x TensorCores get a tile (v5e/v6e have 1 TC; unaffected)."""
    Bp = _round_up(max(B, 8), 8)
    if Bp < 256:
        return Bp                                    # one small step
    return max(128, min(512, _round_up(Bp // 2, 128)))


def policy_forward(state, kernel_params, *, tb=None, return_padded=False):
    """state: [B, state_dim] float32. kernel_params: output of pack_params().

    tb: batch rows per grid step (multiple of 8). Default auto-picks up to 512
        rows/step with >=2 steps when possible. Sweep 256/512/1024 on big
        batches; all weights + a tb=1024 double-buffer is still < 3 MiB VMEM.
    return_padded: if True, return the raw [Bp, 128] bf16 slab (rows >= B and
        lanes >= action_dim are padding) so the consumer can fuse the slice and
        avoid an extra HBM pass.
    """
    w1, b1 = kernel_params["w1"], kernel_params["b1"]
    w2, b2 = kernel_params["w2"], kernel_params["b2"]
    w3, b3 = kernel_params["w3"], kernel_params["b3"]
    action_dim = kernel_params["action_dim"]

    B, S = state.shape
    P = w3.shape[1]                                  # padded (lane-dense) width

    if tb is None:
        tb = _default_tb(B)
    tb = _round_up(max(tb, 8), 8)

    # Pad batch up to a multiple of the tile so the grid covers it exactly.
    Bp = _round_up(B, tb)
    if Bp != B:
        state = jnp.pad(state, ((0, Bp - B), (0, 0)))

    def full(a):                                     # resident weight/bias specs
        nd = a.ndim
        return pl.BlockSpec(a.shape, lambda i, nd=nd: (0,) * nd)

    out = pl.pallas_call(
        policy_kernel,
        out_shape=jax.ShapeDtypeStruct((Bp, P), jnp.bfloat16),
        grid_spec=pltpu.PrefetchScalarGridSpec(
            num_scalar_prefetch=0,
            grid=(Bp // tb,),
            in_specs=[
                pl.BlockSpec((tb, S), lambda i: (i, 0)),   # state tile
                full(w1), full(b1),
                full(w2), full(b2),
                full(w3), full(b3),
            ],
            out_specs=pl.BlockSpec((tb, P), lambda i: (i, 0)),
        ),
        compiler_params=pltpu.CompilerParams(
            dimension_semantics=("parallel",)),            # megacore-shard batch
    )(state, w1, b1, w2, b2, w3, b3)

    if return_padded:
        return out
    # Semantic-parity path (PyTorch returns f32 [B, action_dim]); for best
    # end-to-end HBM traffic, prefer return_padded=True and slice in the consumer.
    return out[:B, :action_dim].astype(jnp.float32)


def init_params(key, state_dim, action_dim, hidden=128):
    """Deterministic init mimicking PyTorch nn.Linear default
    (uniform(-1/sqrt(fan_in), 1/sqrt(fan_in)) for weight and bias)."""
    ks = jax.random.split(key, 6)

    def linear(kw, kb, fan_in, fan_out):
        bound = 1.0 / jnp.sqrt(jnp.float32(fan_in))
        # stored as (in, out) so the kernel computes x @ W
        w = jax.random.uniform(kw, (fan_in, fan_out), jnp.float32, -bound, bound)
        b = jax.random.uniform(kb, (1, fan_out), jnp.float32, -bound, bound)
        return w, b

    w1, b1 = linear(ks[0], ks[1], state_dim, hidden)
    w2, b2 = linear(ks[2], ks[3], hidden, hidden)
    w3, b3 = linear(ks[4], ks[5], hidden, action_dim)
    return {"w1": w1, "b1": b1, "w2": w2, "b2": b2, "w3": w3, "b3": b3}


def pack_params(params, lane=128):
    """Kernel-ready params: f32 fc1 (VPU path), bf16 fc2/fc3 weights, f32
    biases, lane-dense padded fc3 (-1e30 f32 bias on padded lanes)."""
    h, a = params["w3"].shape
    p = max(lane, _round_up(a, lane))
    w3 = jnp.zeros((h, p), jnp.float32).at[:, :a].set(params["w3"])
    b3 = jnp.full((1, p), -1e30, jnp.float32).at[:, :a].set(params["b3"])
    return {
        "w1": params["w1"].astype(jnp.float32),
        "b1": params["b1"].astype(jnp.float32),
        "w2": params["w2"].astype(jnp.bfloat16),
        "b2": params["b2"].astype(jnp.float32),
        "w3": w3.astype(jnp.bfloat16),
        "b3": b3,                                    # MUST stay f32 (pad bias)
        "action_dim": a,
    }


def reference_forward(state, kp):
    """Plain-JAX reference using the same precision policy as the kernel."""
    h1 = jnp.maximum(jnp.dot(state, kp["w1"]) + kp["b1"], 0.0)
    h2 = jnp.maximum(jnp.dot(h1.astype(jnp.bfloat16), kp["w2"],
                             preferred_element_type=jnp.float32) + kp["b2"], 0.0)
    logits = jnp.dot(h2.astype(jnp.bfloat16), kp["w3"],
                     preferred_element_type=jnp.float32) + kp["b3"]
    probs = jax.nn.softmax(logits, axis=-1)
    return probs[:, :kp["action_dim"]]


if __name__ == "__main__":
    # CartPole-v1: state_dim=4, action_dim=2. Batch of 512 -> tb=256, grid=(2,)
    # so both v7x TensorCores get a tile; single-step on v5e/v6e is also fine.
    state_dim, action_dim = 4, 2
    batch = 512

    key = jax.random.PRNGKey(0)
    k_params, k_state = jax.random.split(key)

    params = init_params(k_params, state_dim, action_dim)
    kp = pack_params(params)
    state = jax.random.normal(k_state, (batch, state_dim), jnp.float32)

    probs = jax.block_until_ready(policy_forward(state, kp))
    ref = reference_forward(state, kp)

    assert probs.shape == (batch, action_dim)
    assert probs.dtype == jnp.float32
    assert bool(jnp.all(jnp.isfinite(probs)))
    # bf16 output slab -> ~4e-3 quantization; kernel/reference matmul math matches.
    assert jnp.allclose(probs, ref, atol=8e-3, rtol=2e-2)
    assert jnp.allclose(jnp.sum(probs, axis=-1), 1.0, atol=1e-2)
    print("KERNEL_OK")
</pallas_src>

<mosaic_0001>
module attributes {stable_mosaic.version = 11 : i64} {
  func.func @policy_kernel(%arg0: i32, %arg1: memref<256x4xf32, #tpu.memory_space<vmem>>, %arg2: memref<4x128xf32, #tpu.memory_space<vmem>>, %arg3: memref<1x128xf32, #tpu.memory_space<vmem>>, %arg4: memref<128x128xbf16, #tpu.memory_space<vmem>>, %arg5: memref<1x128xf32, #tpu.memory_space<vmem>>, %arg6: memref<128x128xbf16, #tpu.memory_space<vmem>>, %arg7: memref<1x128xf32, #tpu.memory_space<vmem>>, %arg8: memref<256x128xbf16, #tpu.memory_space<vmem>>) attributes {dimension_semantics = [#tpu.dimension_semantics<parallel>], iteration_bounds = array<i64: 2>, scalar_prefetch = 0 : i64, scratch_operands = 0 : i64, tpu.core_type = #tpu.core_type<tc>, window_params = [{transform_indices = @transform_0, window_bounds = array<i64: 256, 4>}, {pipeline_mode = #tpu.pipeline_mode<synchronous>, transform_indices = @transform_1, window_bounds = array<i64: 4, 128>}, {pipeline_mode = #tpu.pipeline_mode<synchronous>, transform_indices = @transform_2, window_bounds = array<i64: 1, 128>}, {pipeline_mode = #tpu.pipeline_mode<synchronous>, transform_indices = @transform_3, window_bounds = array<i64: 128, 128>}, {pipeline_mode = #tpu.pipeline_mode<synchronous>, transform_indices = @transform_4, window_bounds = array<i64: 1, 128>}, {pipeline_mode = #tpu.pipeline_mode<synchronous>, transform_indices = @transform_5, window_bounds = array<i64: 128, 128>}, {pipeline_mode = #tpu.pipeline_mode<synchronous>, transform_indices = @transform_6, window_bounds = array<i64: 1, 128>}, {transform_indices = @transform_7, window_bounds = array<i64: 256, 128>}]} {
    %c0 = arith.constant 0 : index
    %c0_0 = arith.constant 0 : index
    %0 = vector.load %arg1[%c0, %c0_0] : memref<256x4xf32, #tpu.memory_space<vmem>>, vector<256x4xf32>
    %c0_1 = arith.constant 0 : index
    %c0_2 = arith.constant 0 : index
    %1 = vector.load %arg2[%c0_1, %c0_2] : memref<4x128xf32, #tpu.memory_space<vmem>>, vector<4x128xf32>
    %c0_3 = arith.constant 0 : index
    %c0_4 = arith.constant 0 : index
    %2 = vector.load %arg3[%c0_3, %c0_4] : memref<1x128xf32, #tpu.memory_space<vmem>>, vector<1x128xf32>
    %3 = vector.extract_strided_slice %0 {offsets = [0, 0], sizes = [256, 1], strides = [1, 1]} : vector<256x4xf32> to vector<256x1xf32>
    %4 = vector.extract_strided_slice %1 {offsets = [0, 0], sizes = [1, 128], strides = [1, 1]} : vector<4x128xf32> to vector<1x128xf32>
    %5 = vector.broadcast %3 : vector<256x1xf32> to vector<256x128xf32>
    %6 = vector.broadcast %4 : vector<1x128xf32> to vector<256x128xf32>
    %7 = arith.mulf %5, %6 : vector<256x128xf32>
    %8 = vector.broadcast %2 : vector<1x128xf32> to vector<256x128xf32>
    %9 = arith.addf %8, %7 : vector<256x128xf32>
    %10 = vector.extract_strided_slice %0 {offsets = [0, 1], sizes = [256, 1], strides = [1, 1]} : vector<256x4xf32> to vector<256x1xf32>
    %11 = vector.extract_strided_slice %1 {offsets = [1, 0], sizes = [1, 128], strides = [1, 1]} : vector<4x128xf32> to vector<1x128xf32>
    %12 = vector.broadcast %10 : vector<256x1xf32> to vector<256x128xf32>
    %13 = vector.broadcast %11 : vector<1x128xf32> to vector<256x128xf32>
    %14 = arith.mulf %12, %13 : vector<256x128xf32>
    %15 = arith.addf %9, %14 : vector<256x128xf32>
    %16 = vector.extract_strided_slice %0 {offsets = [0, 2], sizes = [256, 1], strides = [1, 1]} : vector<256x4xf32> to vector<256x1xf32>
    %17 = vector.extract_strided_slice %1 {offsets = [2, 0], sizes = [1, 128], strides = [1, 1]} : vector<4x128xf32> to vector<1x128xf32>
    %18 = vector.broadcast %16 : vector<256x1xf32> to vector<256x128xf32>
    %19 = vector.broadcast %17 : vector<1x128xf32> to vector<256x128xf32>
    %20 = arith.mulf %18, %19 : vector<256x128xf32>
    %21 = arith.addf %15, %20 : vector<256x128xf32>
    %22 = vector.extract_strided_slice %0 {offsets = [0, 3], sizes = [256, 1], strides = [1, 1]} : vector<256x4xf32> to vector<256x1xf32>
    %23 = vector.extract_strided_slice %1 {offsets = [3, 0], sizes = [1, 128], strides = [1, 1]} : vector<4x128xf32> to vector<1x128xf32>
    %24 = vector.broadcast %22 : vector<256x1xf32> to vector<256x128xf32>
    %25 = vector.broadcast %23 : vector<1x128xf32> to vector<256x128xf32>
    %26 = arith.mulf %24, %25 : vector<256x128xf32>
    %27 = arith.addf %21, %26 : vector<256x128xf32>
    %cst = arith.constant 0.000000e+00 : f32
    %28 = vector.broadcast %cst : f32 to vector<256x128xf32>
    %29 = arith.maximumf %27, %28 : vector<256x128xf32>
    %30 = arith.truncf %29 : vector<256x128xf32> to vector<256x128xbf16>
    %c0_5 = arith.constant 0 : index
    %c0_6 = arith.constant 0 : index
    %31 = vector.load %arg4[%c0_5, %c0_6] : memref<128x128xbf16, #tpu.memory_space<vmem>>, vector<128x128xbf16>
    %cst_7 = arith.constant dense<0.000000e+00> : vector<256x128xf32>
    %32 = tpu.matmul %30, %31, %cst_7 {dimension_numbers = #tpu.dot_dimension_numbers<[1], [0], [0], [1], [0, 0, 1, 1], [], []>} : vector<256x128xbf16>, vector<128x128xbf16>, vector<256x128xf32> -> vector<256x128xf32>
    %c0_8 = arith.constant 0 : index
    %c0_9 = arith.constant 0 : index
    %33 = vector.load %arg5[%c0_8, %c0_9] : memref<1x128xf32, #tpu.memory_space<vmem>>, vector<1x128xf32>
    %34 = vector.broadcast %33 : vector<1x128xf32> to vector<256x128xf32>
    %35 = arith.addf %32, %34 : vector<256x128xf32>
    %cst_10 = arith.constant 0.000000e+00 : f32
    %36 = vector.broadcast %cst_10 : f32 to vector<256x128xf32>
    %37 = arith.maximumf %35, %36 : vector<256x128xf32>
    %38 = arith.truncf %37 : vector<256x128xf32> to vector<256x128xbf16>
    %c0_11 = arith.constant 0 : index
    %c0_12 = arith.constant 0 : index
    %39 = vector.load %arg6[%c0_11, %c0_12] : memref<128x128xbf16, #tpu.memory_space<vmem>>, vector<128x128xbf16>
    %cst_13 = arith.constant dense<0.000000e+00> : vector<256x128xf32>
    %40 = tpu.matmul %38, %39, %cst_13 {dimension_numbers = #tpu.dot_dimension_numbers<[1], [0], [0], [1], [0, 0, 1, 1], [], []>} : vector<256x128xbf16>, vector<128x128xbf16>, vector<256x128xf32> -> vector<256x128xf32>
    %c0_14 = arith.constant 0 : index
    %c0_15 = arith.constant 0 : index
    %41 = vector.load %arg7[%c0_14, %c0_15] : memref<1x128xf32, #tpu.memory_space<vmem>>, vector<1x128xf32>
    %42 = vector.broadcast %41 : vector<1x128xf32> to vector<256x128xf32>
    %43 = arith.addf %40, %42 : vector<256x128xf32>
    %cst_16 = arith.constant dense<0xFF800000> : vector<256xf32>
    %44 = vector.multi_reduction <maximumf>, %43, %cst_16 [1] : vector<256x128xf32> to vector<256xf32>
    %45 = vector.shape_cast %44 : vector<256xf32> to vector<256x1xf32>
    %46 = vector.broadcast %45 : vector<256x1xf32> to vector<256x128xf32>
    %47 = arith.subf %43, %46 : vector<256x128xf32>
    %48 = math.exp %47 : vector<256x128xf32>
    %cst_17 = arith.constant dense<0.000000e+00> : vector<256xf32>
    %49 = vector.multi_reduction <add>, %48, %cst_17 [1] : vector<256x128xf32> to vector<256xf32>
    %50 = vector.shape_cast %49 : vector<256xf32> to vector<256x1xf32>
    %51 = vector.broadcast %50 : vector<256x1xf32> to vector<256x128xf32>
    %52 = arith.divf %48, %51 : vector<256x128xf32>
    %53 = arith.truncf %52 : vector<256x128xf32> to vector<256x128xbf16>
    %c0_18 = arith.constant 0 : index
    %c0_19 = arith.constant 0 : index
    %54 = vector.load %arg8[%c0_18, %c0_19] : memref<256x128xbf16, #tpu.memory_space<vmem>>, vector<256x128xbf16>
    tpu.vector_store %arg8[%c0_18, %c0_19], %53 {strides = array<i32>} : memref<256x128xbf16, #tpu.memory_space<vmem>>, vector<256x128xbf16>,
    return
  }
  func.func @transform_0(%arg0: i32) -> (i32, i32) {
    %c0_i32 = arith.constant 0 : i32
    %c0_i32_0 = arith.constant 0 : i32
    return %arg0, %c0_i32 : i32, i32
  }
  func.func @transform_1(%arg0: i32) -> (i32, i32) {
    %c0_i32 = arith.constant 0 : i32
    %c0_i32_0 = arith.constant 0 : i32
    %c0_i32_1 = arith.constant 0 : i32
    return %c0_i32, %c0_i32_0 : i32, i32
  }
  func.func @transform_2(%arg0: i32) -> (i32, i32) {
    %c0_i32 = arith.constant 0 : i32
    %c0_i32_0 = arith.constant 0 : i32
    %c0_i32_1 = arith.constant 0 : i32
    return %c0_i32, %c0_i32_0 : i32, i32
  }
  func.func @transform_3(%arg0: i32) -> (i32, i32) {
    %c0_i32 = arith.constant 0 : i32
    %c0_i32_0 = arith.constant 0 : i32
    %c0_i32_1 = arith.constant 0 : i32
    return %c0_i32, %c0_i32_0 : i32, i32
  }
  func.func @transform_4(%arg0: i32) -> (i32, i32) {
    %c0_i32 = arith.constant 0 : i32
    %c0_i32_0 = arith.constant 0 : i32
    %c0_i32_1 = arith.constant 0 : i32
    return %c0_i32, %c0_i32_0 : i32, i32
  }
  func.func @transform_5(%arg0: i32) -> (i32, i32) {
    %c0_i32 = arith.constant 0 : i32
    %c0_i32_0 = arith.constant 0 : i32
    %c0_i32_1 = arith.constant 0 : i32
    return %c0_i32, %c0_i32_0 : i32, i32
  }
  func.func @transform_6(%arg0: i32) -> (i32, i32) {
    %c0_i32 = arith.constant 0 : i32
    %c0_i32_0 = arith.constant 0 : i32
    %c0_i32_1 = arith.constant 0 : i32
    return %c0_i32, %c0_i32_0 : i32, i32
  }
  func.func @transform_7(%arg0: i32) -> (i32, i32) {
    %c0_i32 = arith.constant 0 : i32
    %c0_i32_0 = arith.constant 0 : i32
    return %arg0, %c0_i32 : i32, i32
  }
}

</mosaic_0001>

<bundles_post_ra>
// kernel: tpu_custom_call.1
= control target key start
LH: loop header
LB: loop body
LE: loop exit
PB: predicated region body
PF: predicated region fallthrough
CT: control target
= control target key end

     0   :  { %12 = vsyncpa [#allocation3], 0  ;;  %s4584_s0 = inlined_call_operand.vmem [shape: f32[512,4], index: 0, kind: input, shape index: {}]   ;;  %s4585_s1 = inlined_call_operand.vmem [shape: f32[4,128], index: 1, kind: input, shape index: {}]   ;;  %s4586_s2 = inlined_call_operand.vmem [shape: f32[1,128], index: 2, kind: input, shape index: {}]   ;;  %s4587_s3 = inlined_call_operand.vmem [shape: bf16[128,128], index: 3, kind: input, shape index: {}]   ;;  %s4588_s4 = inlined_call_operand.vmem [shape: f32[1,128], index: 4, kind: input, shape index: {}]   ;;  %s4589_s5 = inlined_call_operand.vmem [shape: bf16[128,128], index: 5, kind: input, shape index: {}]   ;;  %s4590_s6 = inlined_call_operand.vmem [shape: f32[1,128], index: 6, kind: input, shape index: {}]   ;;  %s4591_s7 = inlined_call_operand.hbm [shape: bf16[512,128], index: 7, kind: output, shape index: {}]  }
   0x1   :  { %14 = vsyncpa [#allocation3 + $0x1], 0  ;;  %s2910_s24 = smov 0   ;;  %s2912_s25 = smov 0  }
   0x2   :  { %s2914_s26 = smov 0   ;;  %s2916_s27 = smov 0  }
   0x3 LB: > { %s2931_s28 = sadd.s32 4294967295, %s2862_s27   ;;  %s2377_s29 = sadd.s32 4294967294, %s2862_s27   ;;  %s2862_s27 = sphi %s2916_s27, %s4750_s27   ;;  %s2858_s26 = sphi %s2914_s26, %s4749_s26   ;;  %s2854_s25 = sphi %s2912_s25, %s4748_s25   ;;  %s2850_s24 = sphi %s2910_s24, %s4747_s24  }
   0x4   : > { %s2935_s30 = sadd.s32 1, %s2862_s27   ;;  %s179_s8 = sadd.s32 1, %s2858_s26 }
   0x5   : > { %s176_s9 = ssub.s32 %s2862_s27, %s2935_s30  ;;  %p189_p0 = scmp.ne.s32.totalorder %s2858_s26, %s2854_s25 }
   0x6   : > { %p177_p1 = scmp.eq.s32.totalorder %s176_s9, 0  ;;  %p190_p2 = scmp.eq.s32.totalorder %s2931_s28, 1 }
   0x7   : > { %p195_p3 = scmp.ne.s32.totalorder %s2854_s25, %s2850_s24  ;;  %p196_p4 = scmp.eq.s32.totalorder %s2377_s29, 1 }
   0x8   : > { %s2946_s10 = scalar_select %p177_p1, %s2858_s26, %s179_s8  }
   0x9   : > { %p2948_p5 = por %p190_p2, %p189_p0  ;;  %p2952_p6 = por %p196_p4, %p195_p3 }
   0xa   : > { %p2380_p7 = scmp.ge.s32.totalorder %s2862_s27, 1  ;;  %p241_p8 = scmp.lt.s32.totalorder %s2862_s27, 3 }
   0xc   : > { %p242_p9 = pnand %p2380_p7, %p241_p8 }
   0xe   : > { %245 = sbr.rel (%p242_p9) target bundleno = 1079 (0x437), region = 48 }
  0x13   : > { %s2382_s13 = sshll.u32 %s2931_s28, 5  ;;  %v2864_v0 = vmov 0   ;;  %v2865_v33 = vmov 1   ;;  %v4592_v58 = vmov 2   ;;  %s270_s16 = sand.u32 1, %s2854_s25  }
  0x14   : > { %2628 = vset.pattern.permute.xlu2 %v2864_v0  ;;  %2627 = vset.pattern.permute.xlu1 %v2864_v0  ;;  %p274_p10 = scmp.lt.s32.totalorder %s2382_s13, 63  ;;  %s2469_s19 = sshll.u32 %s2931_s28, 7 }
  0x15   : > { %2626 = vset.pattern.permute.xlu0 %v2864_v0  ;;  %s2311_s28 = scalar_lea.hbm %s4591_s7, %s2469_s19  ;;  %s2300_s29 = scalar_lea.sflag [#allocation3], %s270_s16 }
  0x16   : > { %s4752_s13 = smov (!%p274_p10, %s2382_s13), 63  ;;  %s2314_s23 = sshll.u32 %s2311_s28, 4  ;;  %s2315_s23 = int_to_ptr.hbm [resolvable:$true] %s2314_s23 }
  0x17   : > { %s2383_s14 = sshll.u32 %s4752_s13, 3  ;;  %s2814_s8 = sshra.s32 %s2315_s23, 4  ;;  %s2815_s8 = int_to_ptr.hbm [resolvable:$true] %s2814_s8 }
  0x18   : > { %s2962_s17 = scalar_lea.vmem %s4584_s0, %s2383_s14  ;;  %s2816_s9 = scalar_lea.hbm %s2815_s8, 128 }
  0x19   : > { %v2965_v1 = vld [vmem:[%s2962_s17 + $0x20] sm:$0xff]  ;;  %v2968_v2 = vld [vmem:[%s2962_s17 + $0x10] sm:$0xff]  ;;  %v2977_v4 = vld [vmem:[%s2962_s17 + $0x28] sm:$0xff]  ;;  %p2817_p11 = scmp.ne.s32.totalorder %s2815_s8, %s2816_s9  ;;  %s2820_s15 = scalar_lea.hbm %s4591_s7, 256 }
  0x1a   : > { %v2971_v3 = vld [vmem:[%s2962_s17] sm:$0xff]  ;;  %336 = vperm.xlu2 %2628, %v2965_v1   ;;  %326 = vperm.xlu1 %2627, %v2968_v2   ;;  %v2980_v5 = vld [vmem:[%s2962_s17 + $0x18] sm:$0xff]  ;;  %v2983_v6 = vld [vmem:[%s2962_s17 + $0x8] sm:$0xff]  ;;  %p2821_p0 = scmp.lt.s32.totalorder %s2815_s8, %s4591_s7  ;;  %p2822_p1 = scmp.lt.s32.totalorder %s2820_s15, %s2816_s9 }
  0x1b   : > { %316 = vperm.xlu0 %2626, %v2971_v3   ;;  %v2989_v7 = vld [vmem:[%s2962_s17 + $0x40] sm:$0xff]  ;;  %v2992_v8 = vld [vmem:[%s2962_s17 + $0x38] sm:$0xff]  ;;  %v2995_v9 = vld [vmem:[%s2962_s17 + $0x30] sm:$0xff]  ;;  %p2818_p12 = pnand %p2817_p11, %p2948_p5 }
  0x1c   : > { %v3001_v10 = vld [vmem:[%s2962_s17 + $0x58] sm:$0xff]  ;;  %v3004_v11 = vld [vmem:[%s2962_s17 + $0x50] sm:$0xff]  ;;  %v3007_v12 = vld [vmem:[%s2962_s17 + $0x48] sm:$0xff]  ;;  %p2823_p2 = por %p2822_p1, %p2821_p0 }
  0x1d   : > { %v3013_v13 = vld [vmem:[%s2962_s17 + $0x70] sm:$0xff]  ;;  %v3016_v14 = vld [vmem:[%s2962_s17 + $0x68] sm:$0xff]  ;;  %v3019_v15 = vld [vmem:[%s2962_s17 + $0x60] sm:$0xff]  ;;  %p2819_p13 = pneg %p2818_p12 }
  0x1e   : > { %4603 = vst [vmem:[#allocation5_spill] sm:$0xff] %v3013_v13  ;;  %v3025_v16 = vld [vmem:[%s2962_s17 + $0x88] sm:$0xff]  ;;  %v3028_v17 = vld [vmem:[%s2962_s17 + $0x80] sm:$0xff]  ;;  %v3031_v18 = vld [vmem:[%s2962_s17 + $0x78] sm:$0xff] }
  0x1f   : > { %4604 = vst [vmem:[#allocation6_spill] sm:$0xff] %v3031_v18  ;;  %v3037_v19 = vld [vmem:[%s2962_s17 + $0xa0] sm:$0xff]  ;;  %v3040_v20 = vld [vmem:[%s2962_s17 + $0x98] sm:$0xff]  ;;  %v3043_v21 = vld [vmem:[%s2962_s17 + $0x90] sm:$0xff]  ;;  %p2824_p3 = pnand %p2823_p2, %p2819_p13 }
  0x20   : > { %v3049_v22 = vld [vmem:[%s2962_s17 + $0xb8] sm:$0xff]  ;;  %v3052_v23 = vld [vmem:[%s2962_s17 + $0xb0] sm:$0xff]  ;;  %v3055_v24 = vld [vmem:[%s2962_s17 + $0xa8] sm:$0xff] }
  0x21   : > { %v3061_v25 = vld [vmem:[%s2962_s17 + $0xd0] sm:$0xff]  ;;  %v3064_v26 = vld [vmem:[%s2962_s17 + $0xc8] sm:$0xff]  ;;  %v3067_v27 = vld [vmem:[%s2962_s17 + $0xc0] sm:$0xff] }
  0x22   : > { %341 = vperm.xlu2 %2628, %v2977_v4   ;;  %331 = vperm.xlu1 %2627, %v2980_v5   ;;  %v3073_v28 = vld [vmem:[%s2962_s17 + $0xe8] sm:$0xff]  ;;  %v3076_v29 = vld [vmem:[%s2962_s17 + $0xe0] sm:$0xff]  ;;  %v3079_v30 = vld [vmem:[%s2962_s17 + $0xd8] sm:$0xff] }
  0x23   : > { %321 = vperm.xlu0 %2626, %v2983_v6   ;;  %v3085_v31 = vld [vmem:[%s2962_s17 + $0xf8] sm:$0xff]  ;;  %v3088_v32 = vld [vmem:[%s2962_s17 + $0xf0] sm:$0xff]  ;;  %s4084_s17 = sshll.u32 %s270_s16, 7 }
  0x24   : > { %s4128_s18 = scalar_lea.vmem [#allocation2], %s4084_s17 }
  0x25   : > { %s2312_s22 = sshll.u32 %s4128_s18, 4  ;;  %s2313_s22 = int_to_ptr.vmem [resolvable:$true] %s2312_s22 }
  0x2a   : > { %356 = vperm.xlu2 %2628, %v2989_v7   ;;  %351 = vperm.xlu1 %2627, %v2992_v8  }
  0x2b   : > { %346 = vperm.xlu0 %2626, %v2995_v9  }
  0x32   : > { %371 = vperm.xlu2 %2628, %v3001_v10   ;;  %366 = vperm.xlu1 %2627, %v3004_v11  }
  0x33   : > { %361 = vperm.xlu0 %2626, %v3007_v12  }
  0x3a   : > { %386 = vperm.xlu2 %2628, %v3013_v13   ;;  %381 = vperm.xlu1 %2627, %v3016_v14  }
  0x3b   : > { %376 = vperm.xlu0 %2626, %v3019_v15  }
  0x42   : > { %401 = vperm.xlu2 %2628, %v3025_v16   ;;  %396 = vperm.xlu1 %2627, %v3028_v17  }
  0x43   : > { %391 = vperm.xlu0 %2626, %v3031_v18  }
  0x4a   : > { %416 = vperm.xlu2 %2628, %v3037_v19   ;;  %411 = vperm.xlu1 %2627, %v3040_v20  }
  0x4b   : > { %406 = vperm.xlu0 %2626, %v3043_v21  }
  0x52   : > { %431 = vperm.xlu2 %2628, %v3049_v22   ;;  %426 = vperm.xlu1 %2627, %v3052_v23  }
  0x53   : > { %421 = vperm.xlu0 %2626, %v3055_v24  }
  0x5a   : > { %446 = vperm.xlu2 %2628, %v3061_v25   ;;  %441 = vperm.xlu1 %2627, %v3064_v26  }
  0x5b   : > { %436 = vperm.xlu0 %2626, %v3067_v27  }
  0x62   : > { %461 = vperm.xlu2 %2628, %v3073_v28   ;;  %456 = vperm.xlu1 %2627, %v3076_v29  }
  0x63   : > { %451 = vperm.xlu0 %2626, %v3079_v30  }
  0x6a   : > { %2629 = vset.pattern.permute.xlu2 %v2865_v33  ;;  %471 = vperm.xlu1 %2627, %v3085_v31  }
  0x6b   : > { %466 = vperm.xlu0 %2626, %v3088_v32   ;;  %543 = vperm.xlu2 %2629, %v2971_v3  }
  0x72   : > { %2631 = vset.pattern.permute.xlu1 %v2865_v33 }
  0x73   : > { %2630 = vset.pattern.permute.xlu0 %v2865_v33  ;;  %551 = vperm.xlu1 %2631, %v2968_v2  }
  0x74   : > { %555 = vperm.xlu2 %2629, %v2980_v5   ;;  %547 = vperm.xlu0 %2630, %v2983_v6   ;;  %v3096_v34 = vpop.permute.xlu2 %336 }
  0x7b   : > { %559 = vperm.xlu1 %2631, %v2965_v1  }
  0x7c   : > { %563 = vperm.xlu2 %2629, %v2977_v4   ;;  %567 = vperm.xlu0 %2630, %v2995_v9   ;;  %v3101_v35 = vpop.permute.xlu2 %341 }
  0x83   : > { %571 = vperm.xlu1 %2631, %v2992_v8  }
  0x84   : > { %575 = vperm.xlu2 %2629, %v2989_v7   ;;  %579 = vperm.xlu0 %2630, %v3007_v12   ;;  %v3106_v36 = vpop.permute.xlu2 %356 }
  0x85   : > { %4605 = vst [vmem:[#allocation7_spill] sm:$0xff] %v3106_v36  ;;  %v2457_v36 = vld [vmem:[%s4587_s3 + $0x20] sm:$0xff] }
  0x8b   : > { %583 = vperm.xlu1 %2631, %v3004_v11  }
  0x8c   : > { %587 = vperm.xlu2 %2629, %v3001_v10   ;;  %591 = vperm.xlu0 %2630, %v3019_v15   ;;  %v3111_v37 = vpop.permute.xlu2 %371  ;;  %v3113_v38 = vpop.permute.xlu1 %326 }
  0x8d   : > { %4606 = vst [vmem:[#allocation8_spill] sm:$0xff] %v3111_v37  ;;  %v3115_v39 = vpop.permute.xlu0 %316 }
  0x93   : > { %595 = vperm.xlu1 %2631, %v3016_v14  }
  0x94   : > { %599 = vperm.xlu2 %2629, %v3013_v13   ;;  %603 = vperm.xlu0 %2630, %v3031_v18   ;;  %v3120_v40 = vpop.permute.xlu2 %386  ;;  %v3122_v41 = vpop.permute.xlu1 %331 }
  0x95   : > { %4607 = vst [vmem:[#allocation9_spill] sm:$0xff] %v3120_v40  ;;  %v3124_v42 = vpop.permute.xlu0 %321 }
  0x9b   : > { %607 = vperm.xlu1 %2631, %v3028_v17  }
  0x9c   : > { %611 = vperm.xlu2 %2629, %v3025_v16   ;;  %615 = vperm.xlu0 %2630, %v3043_v21   ;;  %v3129_v43 = vpop.permute.xlu2 %401  ;;  %v3131_v44 = vpop.permute.xlu1 %351 }
  0x9d   : > { %4608 = vst [vmem:[#allocation10_spill] sm:$0xff] %v3131_v44  ;;  %v3133_v45 = vpop.permute.xlu0 %346 }
  0x9e   : > { %4609 = vst [vmem:[#allocation11_spill] sm:$0xff] %v3133_v45 }
  0xa3   : > { %619 = vperm.xlu1 %2631, %v3040_v20  }
  0xa4   : > { %623 = vperm.xlu2 %2629, %v3037_v19   ;;  %627 = vperm.xlu0 %2630, %v3055_v24   ;;  %v3138_v46 = vpop.permute.xlu2 %416  ;;  %v3140_v47 = vpop.permute.xlu1 %366 }
  0xa5   : > { %4610 = vst [vmem:[#allocation12_spill] sm:$0xff] %v3140_v47  ;;  %v3142_v48 = vpop.permute.xlu0 %361 }
  0xa6   : > { %4611 = vst [vmem:[#allocation13_spill] sm:$0xff] %v3142_v48 }
  0xab   : > { %631 = vperm.xlu1 %2631, %v3052_v23  }
  0xac   : > { %635 = vperm.xlu2 %2629, %v3049_v22   ;;  %639 = vperm.xlu0 %2630, %v3067_v27   ;;  %v3147_v49 = vpop.permute.xlu2 %431  ;;  %v3149_v50 = vpop.permute.xlu1 %381 }
  0xad   : > { %4612 = vst [vmem:[#allocation14_spill] sm:$0xff] %v3149_v50  ;;  %v3151_v51 = vpop.permute.xlu0 %376 }
  0xae   : > { %4613 = vst [vmem:[#allocation15_spill] sm:$0xff] %v3151_v51 }
  0xb3   : > { %643 = vperm.xlu1 %2631, %v3064_v26  }
  0xb4   : > { %647 = vperm.xlu2 %2629, %v3061_v25   ;;  %651 = vperm.xlu0 %2630, %v3079_v30   ;;  %v3156_v52 = vpop.permute.xlu2 %446  ;;  %v3158_v53 = vpop.permute.xlu1 %396 }
  0xb5   : > { %4614 = vst [vmem:[#allocation16_spill] sm:$0xff] %v3156_v52  ;;  %v3160_v54 = vpop.permute.xlu0 %391 }
  0xb6   : > { %4615 = vst [vmem:[#allocation17_spill] sm:$0xff] %v3160_v54  ;;  %v4594_v54 = vmov 3  }
  0xbb   : > { %655 = vperm.xlu1 %2631, %v3076_v29  }
  0xbc   : > { %659 = vperm.xlu2 %2629, %v3073_v28   ;;  %663 = vperm.xlu0 %2630, %v3088_v32   ;;  %v3165_v55 = vpop.permute.xlu2 %461  ;;  %v3167_v56 = vpop.permute.xlu1 %411 }
  0xbd   : > { %4616 = vst [vmem:[#allocation18_spill] sm:$0xff] %v3165_v55  ;;  %v3169_v57 = vpop.permute.xlu0 %406 }
  0xc3   : > { %667 = vperm.xlu1 %2631, %v3085_v31  }
  0xc4   : > { %2632 = vset.pattern.permute.xlu2 %v4592_v58  ;;  %2633 = vset.pattern.permute.xlu0 %v4592_v58  ;;  %v3174_v59 = vpop.permute.xlu1 %426 }
  0xc5   : > { %736 = vperm.xlu2 %2632, %v2971_v3   ;;  %740 = vperm.xlu0 %2633, %v2983_v6   ;;  %v3178_v60 = vpop.permute.xlu0 %421  ;;  %v3180_v61 = vpop.permute.xlu2 %543 }
  0xcb   : > { %2634 = vset.pattern.permute.xlu1 %v4592_v58 }
  0xcc   : > { %744 = vperm.xlu1 %2634, %v2968_v2   ;;  %v3184_v62 = vpop.permute.xlu1 %441 }
  0xcd   : > { %4617 = vst [vmem:[#allocation19_spill] sm:$0xff] %v3184_v62  ;;  %748 = vperm.xlu2 %2632, %v2980_v5   ;;  %804 = vperm.xlu0 %2633, %v3025_v16   ;;  %v3188_v63 = vpop.permute.xlu0 %436 }
  0xce   : > { %4618 = vst [vmem:[#allocation20_spill] sm:$0xff] %v3188_v63  ;;  %v3190_v0 = vpop.permute.xlu2 %555 }
  0xd4   : > { %752 = vperm.xlu1 %2634, %v2965_v1   ;;  %v3193_v33 = vpop.permute.xlu1 %456 }
  0xd5   : > { %4619 = vst [vmem:[#allocation21_spill] sm:$0xff] %v3193_v33  ;;  %800 = vperm.xlu2 %2632, %v3028_v17   ;;  %2637 = vset.pattern.permute.xlu0 %v4594_v54  ;;  %v3197_v58 = vpop.permute.xlu0 %451 }
  0xd6   : > { %v3199_v40 = vpop.permute.xlu2 %563  ;;  %929 = vperm.xlu0 %2637, %v2971_v3   ;;  %v4622_v3 = vmov 2  }
  0xdc   : > { %2635 = vset.pattern.permute.xlu1 %v4594_v54  ;;  %v3203_v50 = vpop.permute.xlu1 %471 }
  0xdd   : > { %4620 = vst [vmem:[#allocation22_spill] sm:$0xff] %v3203_v50  ;;  %2636 = vset.pattern.permute.xlu2 %v4594_v54  ;;  %v3206_v51 = vpop.permute.xlu0 %466  ;;  %993 = vperm.xlu1 %2635, %v3028_v17  }
  0xde   : > { %997 = vperm.xlu2 %2636, %v3025_v16   ;;  %v3210_v33 = vpop.permute.xlu2 %575  ;;  %1005 = vperm.xlu0 %2637, %v3040_v20  }
  0xdf   : > { %4621 = vst [vmem:[#allocation23_spill] sm:$0xff] %v3210_v33 }
  0xe5   : > { %v3213_v55 = vpop.permute.xlu1 %551  ;;  %933 = vperm.xlu1 %2635, %v2983_v6   ;;  %v4626_v6 = vmov 3  }
  0xe6   : > { %2638 = vset.pattern.permute.xlu2 %v4622_v3  ;;  %v3217_v37 = vpop.permute.xlu2 %587  ;;  %2642 = vset.pattern.permute.xlu0 %v4622_v3  ;;  %v3220_v54 = vpop.permute.xlu0 %547 }
  0xe7   : > { %4623 = vst [vmem:[#allocation24_spill] sm:$0xff] %v3217_v37  ;;  %808 = vperm.xlu2 %2638, %v3043_v21   ;;  %816 = vperm.xlu0 %2642, %v3037_v19  }
  0xed   : > { %v3224_v16 = vpop.permute.xlu1 %559  ;;  %2639 = vset.pattern.permute.xlu1 %v4622_v3 }
  0xee   : > { %v3227_v17 = vpop.permute.xlu2 %599  ;;  %v3229_v50 = vpop.permute.xlu0 %567  ;;  %812 = vperm.xlu1 %2639, %v3040_v20  }
  0xef   : > { %4624 = vst [vmem:[#allocation25_spill] sm:$0xff] %v3227_v17  ;;  %2640 = vset.pattern.permute.xlu2 %v4626_v6  ;;  %836 = vperm.xlu0 %2642, %v3064_v26  }
  0xf0   : > { %4625 = vst [vmem:[#allocation26_spill] sm:$0xff] %v3229_v50  ;;  %1001 = vperm.xlu2 %2640, %v3043_v21  }
  0xf5   : > { %v3235_v37 = vpop.permute.xlu1 %571 }
  0xf6   : > { %4627 = vst [vmem:[#allocation27_spill] sm:$0xff] %v3235_v37  ;;  %v3237_v47 = vpop.permute.xlu2 %611  ;;  %v3239_v52 = vpop.permute.xlu0 %579  ;;  %2641 = vset.pattern.permute.xlu1 %v4626_v6 }
  0xf7   : > { %4628 = vst [vmem:[#allocation28_spill] sm:$0xff] %v3239_v52  ;;  %2650 = vset.pattern.permute.xlu0 %v4626_v6  ;;  %937 = vperm.xlu1 %2641, %v2968_v2  }
  0xf8   : > { %941 = vperm.xlu2 %2640, %v2980_v5   ;;  %945 = vperm.xlu0 %2650, %v2965_v1  }
  0xfd   : > { %v3246_v20 = vpop.permute.xlu1 %583 }
  0xfe   : > { %4629 = vst [vmem:[#allocation29_spill] sm:$0xff] %v3246_v20  ;;  %v3248_v17 = vpop.permute.xlu2 %623  ;;  %v3250_v21 = vpop.permute.xlu0 %591 }
  0xff   : > { %4630 = vst [vmem:[#allocation30_spill] sm:$0xff] %v3250_v21  ;;  %2643 = vset.pattern.permute.xlu1 %v4622_v3 }
 0x100   : > { %1009 = vperm.xlu2 %2640, %v3037_v19   ;;  %1021 = vperm.xlu0 %2650, %v3049_v22  }
 0x101   : > { %820 = vperm.xlu1 %2643, %v3055_v24  }
 0x105   : > { %v3256_v52 = vpop.permute.xlu1 %595 }
 0x106   : > { %4631 = vst [vmem:[#allocation31_spill] sm:$0xff] %v3256_v52  ;;  %v3258_v2 = vpop.permute.xlu2 %635  ;;  %v3260_v5 = vpop.permute.xlu0 %603 }
 0x107   : > { %4632 = vst [vmem:[#allocation32_spill] sm:$0xff] %v3260_v5 }
 0x108   : > { %2645 = vset.pattern.permute.xlu2 %v4622_v3  ;;  %953 = vperm.xlu0 %2650, %v2995_v9  }
 0x109   : > { %2644 = vset.pattern.permute.xlu1 %v4626_v6  ;;  %756 = vperm.xlu2 %2645, %v2977_v4  }
 0x10a   : > { %1013 = vperm.xlu1 %2644, %v3055_v24   ;;  %v2460_v24 = vld [vmem:[%s4587_s3 + $0x38] sm:$0xff] }
 0x10b   : > { %2565 = vmatpush.bf16.msra.mxu2 %v2460_v24  ;;  %1237 = vmatpush.bf16.msra.mxu0 %v2460_v24 }
 0x10d   : > { %v3267_v1 = vpop.permute.xlu1 %607 }
 0x10e   : > { %v3269_v19 = vpop.permute.xlu2 %647  ;;  %v3271_v21 = vpop.permute.xlu0 %615 }
 0x10f   : > { %4633 = vst [vmem:[#allocation33_spill] sm:$0xff] %v3269_v19  ;;  %v3298_v19 = vld [vmem:[%s4585_s1] sm:$0xf] }
 0x110   : > { %961 = vperm.xlu0 %2650, %v2989_v7  }
 0x111   : > { %824 = vperm.xlu2 %2645, %v3052_v23  }
 0x112   : > { %949 = vperm.xlu1 %2644, %v2977_v4   ;;  %v2459_v4 = vld [vmem:[%s4587_s3 + $0x30] sm:$0xff] }
 0x113   : > { %2566 = vmatpush.bf16.msra.mxu2 %v2459_v4  ;;  %1238 = vmatpush.bf16.msra.mxu0 %v2459_v4  ;;  %v3322_v4 = vld [vmem:[%s4586_s2] ss:$0 sm:$0xff] }
 0x115   : > { %v3276_v5 = vpop.permute.xlu1 %619 }
 0x116   : > { %v3278_v52 = vpop.permute.xlu2 %659  ;;  %v3280_v20 = vpop.permute.xlu0 %627 }
 0x117   : > { %4634 = vst [vmem:[#allocation34_spill] sm:$0xff] %v3278_v52 }
 0x118   : > { %1037 = vperm.xlu0 %2650, %v3079_v30  }
 0x119   : > { %2647 = vset.pattern.permute.xlu2 %v4626_v6 }
 0x11a   : > { %2646 = vset.pattern.permute.xlu1 %v4622_v3  ;;  %1017 = vperm.xlu2 %2647, %v3052_v23   ;;  %v3309_v23 = vperm.slane %v3298_v19, 0 }
 0x11b   : > { %828 = vperm.xlu1 %2646, %v3049_v22   ;;  %v2458_v22 = vld [vmem:[%s4587_s3 + $0x28] sm:$0xff] }
 0x11c   : > { %v502_v24 = vmul.f32 %v3309_v23, %v3197_v58  ;;  %2567 = vmatpush.bf16.msra.mxu2 %v2458_v22  ;;  %1239 = vmatpush.bf16.msra.mxu0 %v2458_v22  ;;  %v2456_v22 = vld [vmem:[%s4587_s3 + $0x18] sm:$0xff] }
 0x11d   : > { %v3293_v52 = vpop.permute.xlu1 %631 }
 0x11e   : > { %v3300_v48 = vpop.permute.xlu0 %639 }
 0x11f   : > { %4635 = vst [vmem:[#allocation35_spill] sm:$0xff] %v3300_v48  ;;  %v3302_v33 = vpop.permute.xlu2 %736  ;;  %v3325_v48 = vperm.slane %v3298_v19, 1 }
 0x120   : > { %969 = vperm.xlu0 %2650, %v3004_v11   ;;  %2568 = vmatpush.bf16.msra.mxu2 %v2457_v36 }
 0x121   : > { %1240 = vmatpush.bf16.msra.mxu0 %v2457_v36 }
 0x122   : > { %2648 = vset.pattern.permute.xlu2 %v4622_v3 }
 0x123   : > { %760 = vperm.xlu1 %2646, %v2995_v9   ;;  %764 = vperm.xlu2 %2648, %v2992_v8   ;;  %v537_v9 = vadd.f32 %v3322_v4, %v502_v24  ;;  %v2455_v24 = vld [vmem:[%s4587_s3 + $0x10] sm:$0xff] }
 0x124   : > { %2569 = vmatpush.bf16.msra.mxu2 %v2456_v22 }
 0x125   : > { %v3327_v63 = vpop.permute.xlu1 %643  ;;  %1241 = vmatpush.bf16.msra.mxu0 %v2456_v22  ;;  %v2453_v22 = vld [vmem:[%s4587_s3] sm:$0xff] }
 0x126   : > { %4636 = vst [vmem:[#allocation36_spill] sm:$0xff] %v3327_v63  ;;  %v652_v58 = vpop.permute.xlu0 %651  ;;  %v505_v63 = vmul.f32 %v3309_v23, %v3206_v51 }
 0x127   : > { %v698_v62 = vmul.f32 %v3325_v48, %v652_v58  ;;  %v3331_v37 = vpop.permute.xlu2 %748 }
 0x128   : > { %2659 = vset.pattern.permute.xlu0 %v4622_v3  ;;  %v540_v36 = vadd.f32 %v3322_v4, %v505_v63  ;;  %2570 = vmatpush.bf16.msra.mxu2 %v2455_v24 }
 0x129   : > { %v3337_v44 = vadd.f32 %v698_v62, %v537_v9  ;;  %852 = vperm.xlu0 %2659, %v3073_v28   ;;  %1242 = vmatpush.bf16.msra.mxu0 %v2455_v24 }
 0x12b   : > { %4637 = vst [vmem:[#allocation37_spill] sm:$0xff] %v3337_v44  ;;  %2649 = vset.pattern.permute.xlu1 %v4626_v6  ;;  %832 = vperm.xlu2 %2648, %v3067_v27  }
 0x12c   : > { %957 = vperm.xlu1 %2649, %v2992_v8   ;;  %v2454_v8 = vld [vmem:[%s4587_s3 + $0x8] sm:$0xff] }
 0x12d   : > { %v3348_v58 = vpop.permute.xlu1 %655  ;;  %2571 = vmatpush.bf16.msra.mxu2 %v2454_v8  ;;  %1243 = vmatpush.bf16.msra.mxu0 %v2454_v8  ;;  %v688_v8 = vmul.f32 %v3325_v48, %v3237_v47  ;;  %v687_v47 = vmul.f32 %v3325_v48, %v3267_v1  ;;  %v476_v1 = vmul.f32 %v3309_v23, %v3124_v42 }
 0x12e   : > { %4638 = vst [vmem:[#allocation38_spill] sm:$0xff] %v3348_v58  ;;  %v664_v62 = vpop.permute.xlu0 %663 }
 0x12f   : > { %v701_v9 = vmul.f32 %v3325_v48, %v664_v62  ;;  %v801_v51 = vpop.permute.xlu2 %800  ;;  %v511_v42 = vadd.f32 %v3322_v4, %v476_v1 }
 0x131   : > { %v3352_v44 = vadd.f32 %v701_v9, %v540_v36  ;;  %2663 = vset.pattern.permute.xlu0 %v4626_v6  ;;  %2572 = vmatpush.bf16.msra.mxu2 %v2453_v22  ;;  %v492_v36 = vmul.f32 %v3309_v23, %v3129_v43  ;;  %v491_v43 = vmul.f32 %v3309_v23, %v3158_v53 }
 0x132   : > { %977 = vperm.xlu0 %2663, %v3019_v15   ;;  %1244 = vmatpush.bf16.msra.mxu0 %v2453_v22 }
 0x133   : > { %4639 = vst [vmem:[#allocation39_spill] sm:$0xff] %v3352_v44  ;;  %2651 = vset.pattern.permute.xlu2 %v4626_v6  ;;  %v527_v44 = vadd.f32 %v3322_v4, %v492_v36  ;;  %v526_v18 = vadd.f32 %v3322_v4, %v491_v43 }
 0x134   : > { %1025 = vperm.xlu1 %2649, %v3067_v27   ;;  %1029 = vperm.xlu2 %2651, %v3064_v26  }
 0x135   : > { %v3362_v63 = vpop.permute.xlu1 %667  ;;  %v720_v50 = vadd.f32 %v688_v8, %v527_v44 }
 0x136   : > { %4640 = vst [vmem:[#allocation40_spill] sm:$0xff] %v3362_v63  ;;  %v3393_v63 = vperm.slane %v3298_v19, 3 }
 0x137   : > { %v741_v24 = vpop.permute.xlu0 %740 }
 0x138   : > { %v998_v62 = vpop.permute.xlu2 %997 }
 0x13a   : > { %1053 = vperm.xlu0 %2663, %v3085_v31  }
 0x13c   : > { %2652 = vset.pattern.permute.xlu1 %v4622_v3  ;;  %2653 = vset.pattern.permute.xlu2 %v4622_v3 }
 0x13d   : > { %768 = vperm.xlu1 %2652, %v2989_v7   ;;  %772 = vperm.xlu2 %2653, %v3007_v12   ;;  %v3384_v7 = vperm.slane %v3298_v19, 2  ;;  %v719_v19 = vadd.f32 %v687_v47, %v526_v18 }
 0x13e   : > { %v3372_v26 = vpop.permute.xlu1 %744 }
 0x13f   : > { %v805_v9 = vpop.permute.xlu0 %804  ;;  %v880_v36 = vmul.f32 %v3384_v7, %v801_v51 }
 0x140   : > { %v881_v58 = vmul.f32 %v3384_v7, %v805_v9  ;;  %v672_v9 = vmul.f32 %v3325_v48, %v3220_v54 }
 0x141   : > { %v3374_v27 = vpop.permute.xlu2 %808 }
 0x142   : > { %985 = vperm.xlu0 %2663, %v3013_v13   ;;  %v1074_v13 = vmul.f32 %v3393_v63, %v998_v62  ;;  %v913_v53 = vadd.f32 %v881_v58, %v720_v50  ;;  %v912_v62 = vadd.f32 %v880_v36, %v719_v19  ;;  %v704_v19 = vadd.f32 %v672_v9, %v511_v42 }
 0x143   : > { %v690_v9 = vmul.f32 %v3325_v48, %v3276_v5 }
 0x144   : > { %v1106_v58 = vadd.f32 %v1074_v13, %v913_v53 }
 0x145   : > { %2654 = vset.pattern.permute.xlu1 %v4626_v6  ;;  %840 = vperm.xlu2 %2653, %v3061_v25  }
 0x146   : > { %965 = vperm.xlu1 %2654, %v3007_v12   ;;  %v3387_v22 = vpop.permute.xlu1 %752  ;;  %v475_v12 = vmul.f32 %v3309_v23, %v3115_v39  ;;  %v671_v39 = vmul.f32 %v3325_v48, %v3180_v61  ;;  %v865_v61 = vmul.f32 %v3384_v7, %v741_v24  ;;  %v1138_v36 = vmax.f32 %v1106_v58, 0.0 }
 0x147   : > { %v493_v24 = vmul.f32 %v3309_v23, %v3169_v57 }
 0x148   : > { %v510_v44 = vadd.f32 %v3322_v4, %v475_v12  ;;  %v930_v18 = vpop.permute.xlu0 %929 }
 0x14a   : > { %v1002_v45 = vpop.permute.xlu2 %1001  ;;  %v703_v47 = vadd.f32 %v671_v39, %v510_v44  ;;  %v494_v39 = vmul.f32 %v3309_v23, %v3167_v56 }
 0x14b   : > { %v1075_v56 = vmul.f32 %v3393_v63, %v1002_v45  ;;  %v477_v45 = vmul.f32 %v3309_v23, %v3113_v38  ;;  %v866_v38 = vmul.f32 %v3384_v7, %v3372_v26 }
 0x14d   : > { %2656 = vset.pattern.permute.xlu2 %v4626_v6 }
 0x14e   : > { %2655 = vset.pattern.permute.xlu1 %v4622_v3  ;;  %1033 = vperm.xlu2 %2656, %v3061_v25   ;;  %v864_v25 = vmul.f32 %v3384_v7, %v3302_v33  ;;  %v897_v33 = vadd.f32 %v865_v61, %v704_v19 }
 0x14f   : > { %844 = vperm.xlu1 %2655, %v3079_v30   ;;  %v994_v51 = vpop.permute.xlu1 %993  ;;  %v1057_v30 = vmul.f32 %v3393_v63, %v930_v18  ;;  %v528_v18 = vadd.f32 %v3322_v4, %v493_v24 }
 0x150   : > { %v1073_v50 = vmul.f32 %v3393_v63, %v994_v51  ;;  %v896_v13 = vadd.f32 %v864_v25, %v703_v47  ;;  %v882_v25 = vmul.f32 %v3384_v7, %v3374_v27  ;;  %v1006_v47 = vpop.permute.xlu0 %1005 }
 0x152   : > { %v1105_v8 = vadd.f32 %v1073_v50, %v912_v62  ;;  %v942_v43 = vpop.permute.xlu2 %941  ;;  %v1089_v51 = vadd.f32 %v1057_v30, %v896_v13  ;;  %v689_v62 = vmul.f32 %v3325_v48, %v3271_v21  ;;  %v478_v21 = vmul.f32 %v3309_v23, %v3122_v41 }
 0x153   : > { %v1076_v30 = vmul.f32 %v3393_v63, %v1006_v47 }
 0x154   : > { %v1137_v12 = vmax.f32 %v1105_v8, 0.0  ;;  %v529_v8 = vadd.f32 %v3322_v4, %v494_v39  ;;  %v721_v42 = vadd.f32 %v689_v62, %v528_v18  ;;  %v513_v41 = vadd.f32 %v3322_v4, %v478_v21 }
 0x156   : > { %2657 = vset.pattern.permute.xlu2 %v4622_v3  ;;  %v1161_v53 = vpack.c.bf16 %v1138_v36, %v1137_v12  ;;  %v722_v61 = vadd.f32 %v690_v9, %v529_v8  ;;  %v914_v27 = vadd.f32 %v882_v25, %v721_v42  ;;  %v674_v36 = vmul.f32 %v3325_v48, %v3190_v0 }
 0x157   : > { %776 = vperm.xlu1 %2655, %v3004_v11   ;;  %780 = vperm.xlu2 %2657, %v3001_v10   ;;  %v934_v54 = vpop.permute.xlu1 %933  ;;  %v1121_v11 = vmax.f32 %v1089_v51, 0.0  ;;  %v512_v51 = vadd.f32 %v3322_v4, %v477_v45  ;;  %v1060_v0 = vmul.f32 %v3393_v63, %v942_v43  ;;  %v691_v8 = vmul.f32 %v3325_v48, %v3248_v17 }
 0x158   : > { %v1058_v44 = vmul.f32 %v3393_v63, %v934_v54  ;;  %1285 = vmatmul.bf16.vlgmr.msra.gmra.mxu2 %v1161_v53  ;;  %v1107_v19 = vadd.f32 %v1075_v56, %v914_v27  ;;  %v867_v53 = vmul.f32 %v3384_v7, %v3331_v37  ;;  %v496_v56 = vmul.f32 %v3309_v23, %v3178_v60 }
 0x159   : > { %v817_v18 = vpop.permute.xlu0 %816  ;;  %v479_v60 = vmul.f32 %v3309_v23, %v3096_v34  ;;  %v676_v34 = vmul.f32 %v3325_v48, %v3199_v40 }
 0x15a   : > { %v1090_v1 = vadd.f32 %v1058_v44, %v897_v33  ;;  %v3430_v50 = vpop.permute.xlu2 %1009  ;;  %v706_v44 = vadd.f32 %v674_v36, %v513_v41  ;;  %v1139_v24 = vmax.f32 %v1107_v19, 0.0  ;;  %v675_v36 = vmul.f32 %v3325_v48, %v3224_v16 }
 0x15b   : > { %v1077_v17 = vmul.f32 %v3393_v63, %v3430_v50 }
 0x15c   : > { %v1122_v58 = vmax.f32 %v1090_v1, 0.0 }
 0x15e   : > { %v1153_v57 = vpack.c.bf16 %v1122_v58, %v1121_v11 }
 0x15f   : > { %2658 = vset.pattern.permute.xlu1 %v4626_v6  ;;  %848 = vperm.xlu2 %2657, %v3076_v29  }
 0x160   : > { %973 = vperm.xlu1 %2658, %v3001_v10   ;;  %v813_v5 = vpop.permute.xlu1 %812  ;;  %1245 = vmatmul.bf16.vlgmr.msra.gmra.mxu0 %v1153_v57  ;;  %v673_v10 = vmul.f32 %v3325_v48, %v3213_v55  ;;  %v899_v55 = vadd.f32 %v867_v53, %v706_v44 }
 0x161   : > { %v883_v12 = vmul.f32 %v3384_v7, %v813_v5  ;;  %v3477_v21 = vpop.permute.xlu0 %836  ;;  %v884_v5 = vmul.f32 %v3384_v7, %v817_v18 }
 0x162   : > { %v705_v39 = vadd.f32 %v673_v10, %v512_v51  ;;  %v1092_v58 = vadd.f32 %v1060_v0, %v899_v55  ;;  %v514_v10 = vadd.f32 %v3322_v4, %v479_v60 }
 0x163   : > { %v915_v13 = vadd.f32 %v883_v12, %v722_v61  ;;  %v3455_v54 = vpop.permute.xlu2 %756 }
 0x164   : > { %v898_v11 = vadd.f32 %v866_v38, %v705_v39  ;;  %v1124_v43 = vmax.f32 %v1092_v58, 0.0  ;;  %v707_v51 = vadd.f32 %v675_v36, %v514_v10  ;;  %v869_v16 = vmul.f32 %v3384_v7, %v3455_v54  ;;  %v4645_v36 = vld [vmem:[#allocation10_spill] sm:$0xff] }
 0x165   : > { %v1108_v33 = vadd.f32 %v1076_v30, %v915_v13  ;;  %v498_v58 = vmul.f32 %v3309_v23, %v3147_v49 }
 0x167   : > { %2660 = vset.pattern.permute.xlu2 %v4626_v6  ;;  %v1140_v1 = vmax.f32 %v1108_v33, 0.0 }
 0x168   : > { %1041 = vperm.xlu1 %2658, %v3076_v29   ;;  %1045 = vperm.xlu2 %2660, %v3073_v28   ;;  %v495_v28 = vmul.f32 %v3309_v23, %v3138_v46  ;;  %v531_v46 = vadd.f32 %v3322_v4, %v496_v56 }
 0x169   : > { %v938_v37 = vpop.permute.xlu1 %937  ;;  %v1162_v62 = vpack.c.bf16 %v1140_v1, %v1139_v24 }
 0x16a   : > { %v1059_v9 = vmul.f32 %v3393_v63, %v938_v37  ;;  %v530_v47 = vadd.f32 %v3322_v4, %v495_v28  ;;  %v946_v53 = vpop.permute.xlu0 %945 }
 0x16b   : > { %1290 = vmatmul.bf16.gmra.mxu2 %v1162_v62  ;;  %v3465_v57 = vpop.permute.xlu2 %824  ;;  %v1061_v38 = vmul.f32 %v3393_v63, %v946_v53  ;;  %v497_v62 = vmul.f32 %v3309_v23, %v3174_v59  ;;  %v4641_v59 = vld [vmem:[#allocation5_spill] sm:$0xff] }
 0x16c   : > { %v1091_v26 = vadd.f32 %v1059_v9, %v898_v11  ;;  %v723_v61 = vadd.f32 %v691_v8, %v530_v47 }
 0x16e   : > { %v1123_v25 = vmax.f32 %v1091_v26, 0.0  ;;  %v916_v27 = vadd.f32 %v884_v5, %v723_v61  ;;  %v694_v26 = vmul.f32 %v3325_v48, %v3258_v2 }
 0x170   : > { %2661 = vset.pattern.permute.xlu1 %v4622_v3  ;;  %2662 = vset.pattern.permute.xlu2 %v4622_v3  ;;  %v1154_v29 = vpack.c.bf16 %v1124_v43, %v1123_v25  ;;  %v1109_v19 = vadd.f32 %v1077_v17, %v916_v27  ;;  %v886_v43 = vmul.f32 %v3384_v7, %v3465_v57  ;;  %v4642_v25 = vld [vmem:[#allocation6_spill] sm:$0xff] }
 0x171   : > { %784 = vperm.xlu1 %2661, %v3019_v15   ;;  %788 = vperm.xlu2 %2662, %v3016_v14   ;;  %v692_v15 = vmul.f32 %v3325_v48, %v3280_v20  ;;  %v480_v20 = vmul.f32 %v3309_v23, %v3101_v35 }
 0x172   : > { %1250 = vmatmul.bf16.gmra.mxu0 %v1154_v29  ;;  %v1141_v44 = vmax.f32 %v1109_v19, 0.0  ;;  %v533_v29 = vadd.f32 %v3322_v4, %v498_v58  ;;  %v1022_v28 = vpop.permute.xlu0 %1021  ;;  %v889_v58 = vmul.f32 %v3384_v7, %v3477_v21 }
 0x173   : > { %v821_v42 = vpop.permute.xlu1 %820  ;;  %v724_v45 = vadd.f32 %v692_v15, %v531_v46  ;;  %v515_v35 = vadd.f32 %v3322_v4, %v480_v20  ;;  %v1080_v57 = vmul.f32 %v3393_v63, %v1022_v28  ;;  %v4643_v46 = vld [vmem:[#allocation11_spill] sm:$0xff] }
 0x174   : > { %v885_v30 = vmul.f32 %v3384_v7, %v821_v42  ;;  %v1018_v12 = vpop.permute.xlu2 %1017  ;;  %v726_v2 = vadd.f32 %v694_v26, %v533_v29  ;;  %v481_v27 = vmul.f32 %v3309_v23, %v4643_v46  ;;  %v2467_v46 = vld [vmem:[%s4589_s5 + $0x30] sm:$0xff] }
 0x175   : > { %v708_v40 = vadd.f32 %v676_v34, %v515_v35  ;;  %v1079_v8 = vmul.f32 %v3393_v63, %v1018_v12  ;;  %v4644_v12 = vld [vmem:[#allocation26_spill] sm:$0xff] }
 0x176   : > { %v917_v13 = vadd.f32 %v885_v30, %v724_v45  ;;  %v677_v60 = vmul.f32 %v3325_v48, %v4644_v12  ;;  %v516_v19 = vadd.f32 %v3322_v4, %v481_v27  ;;  %v4652_v27 = vld [vmem:[#allocation23_spill] sm:$0xff] }
 0x177   : > { %v901_v55 = vadd.f32 %v869_v16, %v708_v40 }
 0x178   : > { %v709_v10 = vadd.f32 %v677_v60, %v516_v19  ;;  %v4653_v60 = vld [vmem:[#allocation13_spill] sm:$0xff]  ;;  %v4654_v19 = vld [vmem:[#allocation28_spill] sm:$0xff] }
 0x179   : > { %2664 = vset.pattern.permute.xlu1 %v4626_v6  ;;  %856 = vperm.xlu2 %2662, %v3088_v32  }
 0x17a   : > { %981 = vperm.xlu1 %2664, %v3016_v14   ;;  %v868_v14 = vmul.f32 %v3384_v7, %v3387_v22  ;;  %v954_v34 = vpop.permute.xlu0 %953 }
 0x17c   : > { %v1014_v50 = vpop.permute.xlu1 %1013  ;;  %v900_v24 = vadd.f32 %v868_v14, %v707_v51 }
 0x17d   : > { %v1078_v41 = vmul.f32 %v3393_v63, %v1014_v50  ;;  %v765_v22 = vpop.permute.xlu2 %764  ;;  %v482_v50 = vmul.f32 %v3309_v23, %v4645_v36  ;;  %v2466_v36 = vld [vmem:[%s4589_s5 + $0x28] sm:$0xff] }
 0x17e   : > { %v1093_v37 = vadd.f32 %v1061_v38, %v900_v24  ;;  %v871_v35 = vmul.f32 %v3384_v7, %v765_v22  ;;  %v4649_v24 = vld [vmem:[#allocation36_spill] sm:$0xff] }
 0x17f   : > { %v1110_v33 = vadd.f32 %v1078_v41, %v917_v13  ;;  %v517_v14 = vadd.f32 %v3322_v4, %v482_v50 }
 0x180   : > { %v1125_v18 = vmax.f32 %v1093_v37, 0.0 }
 0x181   : > { %v1142_v0 = vmax.f32 %v1110_v33, 0.0  ;;  %2666 = vset.pattern.permute.xlu2 %v4626_v6  ;;  %v1063_v33 = vmul.f32 %v3393_v63, %v954_v34 }
 0x182   : > { %2665 = vset.pattern.permute.xlu1 %v4622_v3  ;;  %1049 = vperm.xlu2 %2666, %v3088_v32   ;;  %v693_v32 = vmul.f32 %v3325_v48, %v3293_v52 }
 0x183   : > { %860 = vperm.xlu1 %2665, %v3085_v31   ;;  %v1163_v1 = vpack.c.bf16 %v1142_v0, %v1141_v44  ;;  %v532_v31 = vadd.f32 %v3322_v4, %v497_v62  ;;  %v4647_v44 = vld [vmem:[#allocation19_spill] sm:$0xff]  ;;  %v4648_v0 = vld [vmem:[#allocation20_spill] sm:$0xff] }
 0x184   : > { %v950_v39 = vpop.permute.xlu1 %949  ;;  %v500_v16 = vmul.f32 %v3309_v23, %v4647_v44  ;;  %v499_v40 = vmul.f32 %v3309_v23, %v4648_v0  ;;  %v4655_v0 = vld [vmem:[#allocation16_spill] sm:$0xff] }
 0x185   : > { %v1062_v54 = vmul.f32 %v3393_v63, %v950_v39  ;;  %1295 = vmatmul.bf16.gmra.mxu2 %v1163_v1  ;;  %v725_v52 = vadd.f32 %v693_v32, %v532_v31  ;;  %v833_v42 = vpop.permute.xlu2 %832  ;;  %v696_v1 = vmul.f32 %v3325_v48, %v4649_v24  ;;  %v2464_v24 = vld [vmem:[%s4589_s5 + $0x18] sm:$0xff] }
 0x186   : > { %v535_v62 = vadd.f32 %v3322_v4, %v500_v16  ;;  %v888_v26 = vmul.f32 %v3384_v7, %v833_v42 }
 0x187   : > { %v1094_v11 = vadd.f32 %v1062_v54, %v901_v55  ;;  %v918_v47 = vadd.f32 %v886_v43, %v725_v52 }
 0x188   : > { %v728_v31 = vadd.f32 %v696_v1, %v535_v62 }
 0x189   : > { %v1126_v9 = vmax.f32 %v1094_v11, 0.0  ;;  %v1111_v5 = vadd.f32 %v1079_v8, %v918_v47  ;;  %v4650_v11 = vld [vmem:[#allocation35_spill] sm:$0xff]  ;;  %v2468_v47 = vld [vmem:[%s4589_s5 + $0x38] sm:$0xff] }
 0x18a   : > { %2667 = vset.pattern.permute.xlu2 %v4622_v3  ;;  %v695_v22 = vmul.f32 %v3325_v48, %v4650_v11  ;;  %v921_v29 = vadd.f32 %v889_v58, %v728_v31  ;;  %2573 = vmatpush.bf16.msra.mxu3 %v2468_v47  ;;  %v2463_v58 = vld [vmem:[%s4589_s5 + $0x10] sm:$0xff] }
 0x18b   : > { %792 = vperm.xlu1 %2665, %v4641_v59   ;;  %796 = vperm.xlu2 %2667, %v4642_v25   ;;  %v1155_v49 = vpack.c.bf16 %v1126_v9, %v1125_v18  ;;  %v1143_v17 = vmax.f32 %v1111_v5, 0.0  ;;  %v534_v9 = vadd.f32 %v3322_v4, %v499_v40  ;;  %v4651_v5 = vld [vmem:[#allocation7_spill] sm:$0xff]  ;;  %v501_v40 = vmul.f32 %v3309_v23, %v4655_v0 }
 0x18c   : > { %1442 = vmatpush.bf16.msra.mxu1 %v2468_v47 }
 0x18d   : > { %v829_v56 = vpop.permute.xlu1 %828  ;;  %1255 = vmatmul.bf16.gmra.mxu0 %v1155_v49  ;;  %v727_v49 = vadd.f32 %v695_v22, %v534_v9  ;;  %v536_v62 = vadd.f32 %v3322_v4, %v501_v40 }
 0x18e   : > { %v887_v3 = vmul.f32 %v3384_v7, %v829_v56  ;;  %v1030_v13 = vpop.permute.xlu2 %1029  ;;  %2574 = vmatpush.bf16.msra.mxu3 %v2467_v46 }
 0x18f   : > { %v1082_v43 = vmul.f32 %v3393_v63, %v1030_v13  ;;  %v920_v8 = vadd.f32 %v888_v26, %v727_v49  ;;  %v680_v13 = vmul.f32 %v3325_v48, %v4654_v19 }
 0x190   : > { %v919_v61 = vadd.f32 %v887_v3, %v726_v2  ;;  %1443 = vmatpush.bf16.msra.mxu1 %v2467_v46 }
 0x191   : > { %v1114_v56 = vadd.f32 %v1082_v43, %v921_v29 }
 0x192   : > { %v1112_v15 = vadd.f32 %v1080_v57, %v919_v61  ;;  %v483_v61 = vmul.f32 %v3309_v23, %v4651_v5  ;;  %2575 = vmatpush.bf16.msra.mxu3 %v2466_v36 }
 0x193   : > { %2668 = vset.pattern.permute.xlu1 %v4626_v6  ;;  %v4646_v6 = vld [vmem:[#allocation27_spill] sm:$0xff]  ;;  %v1146_v57 = vmax.f32 %v1114_v56, 0.0  ;;  %v2461_v56 = vld [vmem:[%s4589_s5] sm:$0xff] }
 0x194   : > { %989 = vperm.xlu1 %2668, %v4642_v25   ;;  %v1144_v30 = vmax.f32 %v1112_v15, 0.0  ;;  %v678_v53 = vmul.f32 %v3325_v48, %v4646_v6  ;;  %v518_v12 = vadd.f32 %v3322_v4, %v483_v61  ;;  %1444 = vmatpush.bf16.msra.mxu1 %v2466_v36 }
 0x195   : > { %v761_v45 = vpop.permute.xlu1 %760 }
 0x196   : > { %v1164_v20 = vpack.c.bf16 %v1144_v30, %v1143_v17  ;;  %v870_v41 = vmul.f32 %v3384_v7, %v761_v45  ;;  %v710_v38 = vadd.f32 %v678_v53, %v517_v14  ;;  %v679_v17 = vmul.f32 %v3325_v48, %v4652_v27  ;;  %v4660_v27 = vld [vmem:[#allocation8_spill] sm:$0xff] }
 0x197   : > { %v773_v32 = vpop.permute.xlu2 %772  ;;  %v484_v45 = vmul.f32 %v3309_v23, %v4653_v60  ;;  %v4661_v60 = vld [vmem:[#allocation24_spill] sm:$0xff] }
 0x198   : > { %1300 = vmatmul.bf16.gmra.mxu2 %v1164_v20  ;;  %v902_v51 = vadd.f32 %v870_v41, %v709_v10  ;;  %v903_v55 = vadd.f32 %v871_v35, %v710_v38  ;;  %v711_v50 = vadd.f32 %v679_v17, %v518_v12  ;;  %v962_v41 = vpop.permute.xlu0 %961  ;;  %v873_v53 = vmul.f32 %v3384_v7, %v773_v32 }
 0x199   : > { %v519_v10 = vadd.f32 %v3322_v4, %v484_v45  ;;  %v1065_v6 = vmul.f32 %v3393_v63, %v962_v41  ;;  %v486_v17 = vmul.f32 %v3309_v23, %v4660_v27  ;;  %v682_v45 = vmul.f32 %v3325_v48, %v4661_v60  ;;  %v4668_v27 = vld [vmem:[#allocation14_spill] sm:$0xff] }
 0x19a   : > { %v1095_v54 = vadd.f32 %v1063_v33, %v902_v51  ;;  %v2465_v33 = vld [vmem:[%s4589_s5 + $0x20] sm:$0xff] }
 0x19b   : > { %v712_v35 = vadd.f32 %v680_v13, %v519_v10  ;;  %2576 = vmatpush.bf16.msra.mxu3 %v2465_v33  ;;  %1445 = vmatpush.bf16.msra.mxu1 %v2465_v33  ;;  %v521_v36 = vadd.f32 %v3322_v4, %v486_v17  ;;  %v4662_v13 = vld [vmem:[#allocation18_spill] sm:$0xff]  ;;  %v488_v17 = vmul.f32 %v3309_v23, %v4668_v27 }
 0x19c   : > { %v1127_v25 = vmax.f32 %v1095_v54, 0.0  ;;  %v504_v41 = vmul.f32 %v3309_v23, %v4662_v13  ;;  %v4669_v13 = vld [vmem:[#allocation31_spill] sm:$0xff] }
 0x19d   : > { %v905_v44 = vadd.f32 %v873_v53, %v712_v35  ;;  %v714_v10 = vadd.f32 %v682_v45, %v521_v36  ;;  %v4663_v53 = vld [vmem:[#allocation21_spill] sm:$0xff] }
 0x19e   : > { %v958_v39 = vpop.permute.xlu1 %957  ;;  %v539_v40 = vadd.f32 %v3322_v4, %v504_v41  ;;  %v684_v41 = vmul.f32 %v3325_v48, %v4669_v13 }
 0x19f   : > { %v1064_v37 = vmul.f32 %v3393_v63, %v958_v39  ;;  %v841_v42 = vpop.permute.xlu2 %840  ;;  %v4656_v39 = vld [vmem:[#allocation33_spill] sm:$0xff]  ;;  %2577 = vmatpush.bf16.msra.mxu3 %v2464_v24  ;;  %1446 = vmatpush.bf16.msra.mxu1 %v2464_v24  ;;  %v4665_v24 = vld [vmem:[#allocation38_spill] sm:$0xff] }
 0x1a0   : > { %v1038_v11 = vpop.permute.xlu0 %1037  ;;  %v890_v22 = vmul.f32 %v3384_v7, %v841_v42 }
 0x1a1   : > { %v1096_v18 = vadd.f32 %v1064_v37, %v903_v55  ;;  %v697_v55 = vmul.f32 %v3325_v48, %v4656_v39  ;;  %v1084_v49 = vmul.f32 %v3393_v63, %v1038_v11 }
 0x1a3   : > { %v1128_v59 = vmax.f32 %v1096_v18, 0.0  ;;  %v729_v9 = vadd.f32 %v697_v55, %v536_v62  ;;  %2578 = vmatpush.bf16.msra.mxu3 %v2463_v58  ;;  %1447 = vmatpush.bf16.msra.mxu1 %v2463_v58 }
 0x1a5   : > { %v1156_v52 = vpack.c.bf16 %v1128_v59, %v1127_v25  ;;  %v922_v43 = vadd.f32 %v890_v22, %v729_v9  ;;  %v2462_v25 = vld [vmem:[%s4589_s5 + $0x8] sm:$0xff] }
 0x1a6   : > { %v1026_v28 = vpop.permute.xlu1 %1025 }
 0x1a7   : > { %v1081_v2 = vmul.f32 %v3393_v63, %v1026_v28  ;;  %1260 = vmatmul.bf16.gmra.mxu0 %v1156_v52  ;;  %v4657_v52 = vld [vmem:[#allocation37_spill] sm:$0xff]  ;;  %2579 = vmatpush.bf16.msra.mxu3 %v2462_v25 }
 0x1a8   : > { %v1034_v34 = vpop.permute.xlu2 %1033  ;;  %1448 = vmatpush.bf16.msra.mxu1 %v2462_v25  ;;  %v970_v47 = vpop.permute.xlu0 %969 }
 0x1a9   : > { %v1113_v21 = vadd.f32 %v1081_v2, %v920_v8  ;;  %v1083_v31 = vmul.f32 %v3393_v63, %v1034_v34  ;;  %v4658_v2 = vld [vmem:[#allocation12_spill] sm:$0xff]  ;;  %v503_v34 = vmul.f32 %v3309_v23, %v4663_v53 }
 0x1ab   : > { %v1145_v3 = vmax.f32 %v1113_v21, 0.0  ;;  %v1115_v29 = vadd.f32 %v1083_v31, %v922_v43  ;;  %v485_v21 = vmul.f32 %v3309_v23, %v4658_v2  ;;  %2580 = vmatpush.bf16.msra.mxu3 %v2461_v56  ;;  %v4666_v2 = vld [vmem:[#allocation15_spill] sm:$0xff] }
 0x1ac   : > { %1449 = vmatpush.bf16.msra.mxu1 %v2461_v56 }
 0x1ad   : > { %v1165_v15 = vpack.c.bf16 %v1146_v57, %v1145_v3  ;;  %v1147_v57 = vmax.f32 %v1115_v29, 0.0  ;;  %v4659_v3 = vld [vmem:[#allocation29_spill] sm:$0xff] }
 0x1ae   : > { %v681_v5 = vmul.f32 %v3325_v48, %v4659_v3 }
 0x1af   : > { %v769_v30 = vpop.permute.xlu1 %768  ;;  %1305 = vmatmul.bf16.gmra.mxu2 %v1165_v15 }
 0x1b0   : > { %v872_v20 = vmul.f32 %v3384_v7, %v769_v30  ;;  %v520_v30 = vadd.f32 %v3322_v4, %v485_v21  ;;  %v853_v35 = vpop.permute.xlu0 %852  ;;  %v487_v21 = vmul.f32 %v3309_v23, %v4666_v2 }
 0x1b1   : > { %v781_v32 = vpop.permute.xlu2 %780  ;;  %v893_v39 = vmul.f32 %v3384_v7, %v853_v35 }
 0x1b2   : > { %v904_v14 = vadd.f32 %v872_v20, %v711_v50  ;;  %v713_v20 = vadd.f32 %v681_v5, %v520_v30  ;;  %v875_v50 = vmul.f32 %v3384_v7, %v781_v32  ;;  %v522_v30 = vadd.f32 %v3322_v4, %v487_v21 }
 0x1b4   : > { %v1097_v38 = vadd.f32 %v1065_v6, %v904_v14  ;;  %v1067_v6 = vmul.f32 %v3393_v63, %v970_v47  ;;  %v4664_v14 = vld [vmem:[#allocation34_spill] sm:$0xff] }
 0x1b5   : > { %v700_v33 = vmul.f32 %v3325_v48, %v4664_v14  ;;  %v523_v14 = vadd.f32 %v3322_v4, %v488_v17 }
 0x1b6   : > { %v1129_v54 = vmax.f32 %v1097_v38, 0.0 }
 0x1b8   : > { %v966_v51 = vpop.permute.xlu1 %965  ;;  %v978_v36 = vpop.permute.xlu0 %977 }
 0x1b9   : > { %v1066_v16 = vmul.f32 %v3393_v63, %v966_v51  ;;  %v849_v61 = vpop.permute.xlu2 %848 }
 0x1ba   : > { %v892_v62 = vmul.f32 %v3384_v7, %v849_v61 }
 0x1bb   : > { %v1098_v1 = vadd.f32 %v1066_v16, %v905_v44  ;;  %v907_v44 = vadd.f32 %v875_v50, %v714_v10 }
 0x1bd   : > { %v1130_v37 = vmax.f32 %v1098_v1, 0.0  ;;  %v699_v1 = vmul.f32 %v3325_v48, %v4665_v24 }
 0x1bf   : > { %v1157_v18 = vpack.c.bf16 %v1130_v37, %v1129_v54  ;;  %v538_v37 = vadd.f32 %v3322_v4, %v503_v34  ;;  %v732_v54 = vadd.f32 %v700_v33, %v539_v40 }
 0x1c1   : > { %v845_v26 = vpop.permute.xlu1 %844  ;;  %1265 = vmatmul.bf16.gmra.mxu0 %v1157_v18  ;;  %v731_v32 = vadd.f32 %v699_v1, %v538_v37  ;;  %v925_v18 = vadd.f32 %v893_v39, %v732_v54  ;;  %v4670_v39 = vld [vmem:[#allocation22_spill] sm:$0xff] }
 0x1c2   : > { %v891_v59 = vmul.f32 %v3384_v7, %v845_v26  ;;  %v1046_v16 = vpop.permute.xlu2 %1045 }
 0x1c3   : > { %v1086_v11 = vmul.f32 %v3393_v63, %v1046_v16  ;;  %v924_v26 = vadd.f32 %v892_v62, %v731_v32  ;;  %v716_v16 = vadd.f32 %v684_v41, %v523_v14  ;;  %v4671_v62 = vld [vmem:[#allocation40_spill] sm:$0xff] }
 0x1c4   : > { %v923_v28 = vadd.f32 %v891_v59, %v4657_v52 }
 0x1c5   : > { %v1118_v43 = vadd.f32 %v1086_v11, %v925_v18  ;;  %v702_v11 = vmul.f32 %v3325_v48, %v4671_v62 }
 0x1c6   : > { %v1116_v8 = vadd.f32 %v1084_v49, %v923_v28  ;;  %v3639_v28 = vld [vmem:[%s4588_s4] ss:$0 sm:$0xff] }
 0x1c8   : > { %v1148_v42 = vmax.f32 %v1116_v8, 0.0  ;;  %v1150_v8 = vmax.f32 %v1118_v43, 0.0 }
 0x1c9   : > { %v777_v15 = vpop.permute.xlu1 %776 }
 0x1ca   : > { %v1166_v46 = vpack.c.bf16 %v1148_v42, %v1147_v57  ;;  %v874_v12 = vmul.f32 %v3384_v7, %v777_v15  ;;  %v4667_v42 = vld [vmem:[#allocation30_spill] sm:$0xff] }
 0x1cb   : > { %v789_v49 = vpop.permute.xlu2 %788  ;;  %v683_v3 = vmul.f32 %v3325_v48, %v4667_v42 }
 0x1cc   : > { %1310 = vmatmul.bf16.gmra.mxu2 %v1166_v46  ;;  %v906_v19 = vadd.f32 %v874_v12, %v713_v20  ;;  %v877_v33 = vmul.f32 %v3384_v7, %v789_v49 }
 0x1ce   : > { %v1099_v0 = vadd.f32 %v1067_v6, %v906_v19  ;;  %v715_v19 = vadd.f32 %v683_v3, %v522_v30  ;;  %v4673_v30 = vld [vmem:[#allocation9_spill] sm:$0xff] }
 0x1d0   : > { %v1131_v58 = vmax.f32 %v1099_v0, 0.0  ;;  %v909_v0 = vadd.f32 %v877_v33, %v716_v16 }
 0x1d2   : > { %v974_v51 = vpop.permute.xlu1 %973 }
 0x1d3   : > { %v1068_v38 = vmul.f32 %v3393_v63, %v974_v51  ;;  %v857_v10 = vpop.permute.xlu2 %856  ;;  %v1069_v51 = vmul.f32 %v3393_v63, %v978_v36 }
 0x1d4   : > { %v894_v18 = vmul.f32 %v3384_v7, %v857_v10 }
 0x1d5   : > { %v1100_v55 = vadd.f32 %v1068_v38, %v907_v44 }
 0x1d7   : > { %v1132_v22 = vmax.f32 %v1100_v55, 0.0  ;;  %v506_v55 = vmul.f32 %v3309_v23, %v4670_v39 }
 0x1d9   : > { %v1158_v9 = vpack.c.bf16 %v1132_v22, %v1131_v58 }
 0x1da   : > { %v1042_v31 = vpop.permute.xlu1 %1041 }
 0x1db   : > { %v1085_v59 = vmul.f32 %v3393_v63, %v1042_v31  ;;  %1270 = vmatmul.bf16.gmra.mxu0 %v1158_v9  ;;  %v1286_v25 = vpop.f32.mrf.mxu2  ;;  %v541_v9 = vadd.f32 %v3322_v4, %v506_v55 }
 0x1dc   : > { %v1287_v57 = vadd.f32 %v3639_v28, %v1286_v25  ;;  %v1050_v22 = vpop.permute.xlu2 %1049 }
 0x1dd   : > { %v1117_v29 = vadd.f32 %v1085_v59, %v924_v26  ;;  %v1246_v52 = vpop.f32.mrf.mxu0  ;;  %v1087_v26 = vmul.f32 %v3393_v63, %v1050_v22  ;;  %v734_v43 = vadd.f32 %v702_v11, %v541_v9  ;;  %v1054_v59 = vpop.permute.xlu0 %1053 }
 0x1de   : > { %v1247_v15 = vadd.f32 %v3639_v28, %v1246_v52  ;;  %v1342_v45 = vmax.f32 %v1287_v57, 0.0 }
 0x1df   : > { %v1149_v56 = vmax.f32 %v1117_v29, 0.0  ;;  %v4672_v29 = vld [vmem:[#allocation39_spill] sm:$0xff] }
 0x1e0   : > { %v1326_v6 = vmax.f32 %v1247_v15, 0.0  ;;  %v926_v52 = vadd.f32 %v894_v18, %v4672_v29 }
 0x1e1   : > { %v1167_v47 = vpack.c.bf16 %v1150_v8, %v1149_v56  ;;  %v1088_v8 = vmul.f32 %v3393_v63, %v1054_v59 }
 0x1e2   : > { %v1119_v42 = vadd.f32 %v1087_v26, %v926_v52 }
 0x1e3   : > { %v785_v5 = vpop.permute.xlu1 %784  ;;  %1315 = vmatmul.bf16.gmra.mxu2 %v1167_v47  ;;  %v1288_v61 = vpop.f32.mrf.mxu2 }
 0x1e4   : > { %v1289_v46 = vadd.f32 %v3639_v28, %v1288_v61  ;;  %v876_v12 = vmul.f32 %v3384_v7, %v785_v5 }
 0x1e5   : > { %v1248_v60 = vpop.f32.mrf.mxu0  ;;  %v797_v14 = vpop.permute.xlu2 %796 }
 0x1e6   : > { %v1343_v20 = vmax.f32 %v1289_v46, 0.0  ;;  %v1249_v50 = vadd.f32 %v3639_v28, %v1248_v60  ;;  %v908_v35 = vadd.f32 %v876_v12, %v715_v19  ;;  %v489_v12 = vmul.f32 %v3309_v23, %v4673_v30 }
 0x1e8   : > { %v1327_v53 = vmax.f32 %v1249_v50, 0.0  ;;  %v1366_v34 = vpack.c.bf16 %v1343_v20, %v1342_v45  ;;  %v1101_v40 = vadd.f32 %v1069_v51, %v908_v35  ;;  %v1151_v45 = vmax.f32 %v1119_v42, 0.0  ;;  %v4674_v50 = vld [vmem:[#allocation25_spill] sm:$0xff]  ;;  %v4676_v35 = vld [vmem:[#allocation32_spill] sm:$0xff] }
 0x1e9   : > { %v685_v19 = vmul.f32 %v3325_v48, %v4674_v50  ;;  %v524_v10 = vadd.f32 %v3322_v4, %v489_v12  ;;  %v686_v51 = vmul.f32 %v3325_v48, %v4676_v35 }
 0x1ea   : > { %1490 = vmatmul.bf16.vlgmr.msra.gmra.mxu3 %v1366_v34  ;;  %v1358_v44 = vpack.c.bf16 %v1327_v53, %v1326_v6  ;;  %v1133_v58 = vmax.f32 %v1101_v40, 0.0  ;;  %v4675_v6 = vld [vmem:[#allocation17_spill] sm:$0xff] }
 0x1eb   : > { %v490_v53 = vmul.f32 %v3309_v23, %v4675_v6  ;;  %v717_v33 = vadd.f32 %v685_v19, %v524_v10 }
 0x1ec   : > { %v982_v38 = vpop.permute.xlu1 %981  ;;  %1450 = vmatmul.bf16.vlgmr.msra.gmra.mxu1 %v1358_v44  ;;  %v986_v44 = vpop.permute.xlu0 %985 }
 0x1ed   : > { %v1070_v24 = vmul.f32 %v3393_v63, %v982_v38  ;;  %v525_v16 = vadd.f32 %v3322_v4, %v490_v53  ;;  %v879_v38 = vmul.f32 %v3384_v7, %v797_v14 }
 0x1ee   : > { %v1291_v1 = vpop.f32.mrf.mxu2 }
 0x1ef   : > { %v1102_v37 = vadd.f32 %v1070_v24, %v909_v0  ;;  %v1251_v54 = vpop.f32.mrf.mxu0  ;;  %v1292_v25 = vadd.f32 %v3639_v28, %v1291_v1  ;;  %v718_v40 = vadd.f32 %v686_v51, %v525_v16  ;;  %v1071_v24 = vmul.f32 %v3393_v63, %v986_v44 }
 0x1f0   : > { %v1252_v56 = vadd.f32 %v3639_v28, %v1251_v54 }
 0x1f1   : > { %v1134_v32 = vmax.f32 %v1102_v37, 0.0  ;;  %v1344_v61 = vmax.f32 %v1292_v25, 0.0  ;;  %v911_v39 = vadd.f32 %v879_v38, %v718_v40 }
 0x1f2   : > { %v1328_v46 = vmax.f32 %v1252_v56, 0.0 }
 0x1f3   : > { %v1159_v31 = vpack.c.bf16 %v1134_v32, %v1133_v58 }
 0x1f5   : > { %v861_v49 = vpop.permute.xlu1 %860  ;;  %1275 = vmatmul.bf16.gmra.mxu0 %v1159_v31 }
 0x1f6   : > { %v895_v2 = vmul.f32 %v3384_v7, %v861_v49  ;;  %v1293_v21 = vpop.f32.mrf.mxu2 }
 0x1f7   : > { %v1294_v47 = vadd.f32 %v3639_v28, %v1293_v21  ;;  %v1253_v57 = vpop.f32.mrf.mxu0 }
 0x1f8   : > { %v927_v3 = vadd.f32 %v895_v2, %v734_v43  ;;  %v1254_v5 = vadd.f32 %v3639_v28, %v1253_v57 }
 0x1f9   : > { %v1345_v15 = vmax.f32 %v1294_v47, 0.0 }
 0x1fa   : > { %v1329_v27 = vmax.f32 %v1254_v5, 0.0  ;;  %v1120_v17 = vadd.f32 %v1088_v8, %v927_v3 }
 0x1fb   : > { %v1367_v60 = vpack.c.bf16 %v1345_v15, %v1344_v61 }
 0x1fc   : > { %v1359_v20 = vpack.c.bf16 %v1329_v27, %v1328_v46  ;;  %v1152_v36 = vmax.f32 %v1120_v17, 0.0 }
 0x1fd   : > { %v793_v13 = vpop.permute.xlu1 %792  ;;  %1495 = vmatmul.bf16.gmra.mxu3 %v1367_v60 }
 0x1fe   : > { %1455 = vmatmul.bf16.gmra.mxu1 %v1359_v20  ;;  %v1168_v41 = vpack.c.bf16 %v1152_v36, %v1151_v45  ;;  %v878_v34 = vmul.f32 %v3384_v7, %v793_v13 }
 0x200   : > { %1320 = vmatmul.bf16.gmra.mxu2 %v1168_v41  ;;  %v910_v0 = vadd.f32 %v878_v34, %v717_v33 }
 0x202   : > { %v1103_v55 = vadd.f32 %v1071_v24, %v910_v0 }
 0x204   : > { %v1135_v22 = vmax.f32 %v1103_v55, 0.0 }
 0x206   : > { %v990_v1 = vpop.permute.xlu1 %989 }
 0x207   : > { %v1072_v23 = vmul.f32 %v3393_v63, %v990_v1 }
 0x208   : > { %v1296_v37 = vpop.f32.mrf.mxu2 }
 0x209   : > { %v1104_v54 = vadd.f32 %v1072_v23, %v911_v39  ;;  %v1297_v58 = vadd.f32 %v3639_v28, %v1296_v37  ;;  %v3706_v23 = vld [vmem:[%s4590_s6] ss:$0 sm:$0xff] }
 0x20a   : > { %v1256_v62 = vpop.f32.mrf.mxu0 }
 0x20b   : > { %v1136_v11 = vmax.f32 %v1104_v54, 0.0  ;;  %v1257_v7 = vadd.f32 %v3639_v28, %v1256_v62  ;;  %v1346_v9 = vmax.f32 %v1297_v58, 0.0 }
 0x20d   : > { %v1160_v48 = vpack.c.bf16 %v1136_v11, %v1135_v22  ;;  %v1330_v26 = vmax.f32 %v1257_v7, 0.0 }
 0x20f   : > { %1280 = vmatmul.bf16.gmra.mxu0 %v1160_v48 }
 0x210   : > { %v1298_v4 = vpop.f32.mrf.mxu2 }
 0x211   : > { %v1299_v32 = vadd.f32 %v3639_v28, %v1298_v4 }
 0x212   : > { %v1258_v18 = vpop.f32.mrf.mxu0 }
 0x213   : > { %v1347_v31 = vmax.f32 %v1299_v32, 0.0  ;;  %v1259_v63 = vadd.f32 %v3639_v28, %v1258_v18 }
 0x215   : > { %v1331_v43 = vmax.f32 %v1259_v63, 0.0  ;;  %v1368_v59 = vpack.c.bf16 %v1347_v31, %v1346_v9 }
 0x217   : > { %1500 = vmatmul.bf16.gmra.mxu3 %v1368_v59  ;;  %v1360_v25 = vpack.c.bf16 %v1331_v43, %v1330_v26 }
 0x219   : > { %1460 = vmatmul.bf16.gmra.mxu1 %v1360_v25 }
 0x21b   : > { %v1301_v49 = vpop.f32.mrf.mxu2 }
 0x21c   : > { %v1302_v29 = vadd.f32 %v3639_v28, %v1301_v49 }
 0x21e   : > { %v1348_v2 = vmax.f32 %v1302_v29, 0.0 }
 0x223   : > { %v1303_v52 = vpop.f32.mrf.mxu2 }
 0x224   : > { %v1304_v8 = vadd.f32 %v3639_v28, %v1303_v52  ;;  %v1261_v56 = vpop.f32.mrf.mxu0 }
 0x225   : > { %v1262_v57 = vadd.f32 %v3639_v28, %v1261_v56 }
 0x226   : > { %v1349_v21 = vmax.f32 %v1304_v8, 0.0 }
 0x227   : > { %v1332_v5 = vmax.f32 %v1262_v57, 0.0 }
 0x228   : > { %v1369_v47 = vpack.c.bf16 %v1349_v21, %v1348_v2 }
 0x22a   : > { %1505 = vmatmul.bf16.gmra.mxu3 %v1369_v47 }
 0x22c   : > { %v1263_v42 = vpop.f32.mrf.mxu0 }
 0x22d   : > { %v1264_v3 = vadd.f32 %v3639_v28, %v1263_v42 }
 0x22f   : > { %v1333_v61 = vmax.f32 %v1264_v3, 0.0 }
 0x231   : > { %v1361_v15 = vpack.c.bf16 %v1333_v61, %v1332_v5 }
 0x232   : > { %v1306_v46 = vpop.f32.mrf.mxu2 }
 0x233   : > { %1465 = vmatmul.bf16.gmra.mxu1 %v1361_v15  ;;  %v1307_v27 = vadd.f32 %v3639_v28, %v1306_v46 }
 0x235   : > { %v1350_v12 = vmax.f32 %v1307_v27, 0.0 }
 0x23a   : > { %v1308_v17 = vpop.f32.mrf.mxu2 }
 0x23b   : > { %v1309_v30 = vadd.f32 %v3639_v28, %v1308_v17 }
 0x23d   : > { %v1351_v60 = vmax.f32 %v1309_v30, 0.0 }
 0x23e   : > { %v1266_v45 = vpop.f32.mrf.mxu0 }
 0x23f   : > { %v1370_v20 = vpack.c.bf16 %v1351_v60, %v1350_v12  ;;  %v1267_v36 = vadd.f32 %v3639_v28, %v1266_v45 }
 0x241   : > { %1510 = vmatmul.bf16.gmra.mxu3 %v1370_v20  ;;  %v1334_v13 = vmax.f32 %v1267_v36, 0.0 }
 0x246   : > { %v1268_v50 = vpop.f32.mrf.mxu0 }
 0x247   : > { %v1269_v19 = vadd.f32 %v3639_v28, %v1268_v50 }
 0x249   : > { %v1335_v41 = vmax.f32 %v1269_v19, 0.0 }
 0x24b   : > { %v1362_v10 = vpack.c.bf16 %v1335_v41, %v1334_v13 }
 0x24d   : > { %1470 = vmatmul.bf16.gmra.mxu1 %v1362_v10 }
 0x24f   : > { %v1311_v6 = vpop.f32.mrf.mxu2 }
 0x250   : > { %v1312_v53 = vadd.f32 %v3639_v28, %v1311_v6 }
 0x252   : > { %v1352_v35 = vmax.f32 %v1312_v53, 0.0 }
 0x257   : > { %v1313_v34 = vpop.f32.mrf.mxu2 }
 0x258   : > { %v1314_v14 = vadd.f32 %v3639_v28, %v1313_v34  ;;  %v1271_v33 = vpop.f32.mrf.mxu0 }
 0x259   : > { %v1272_v16 = vadd.f32 %v3639_v28, %v1271_v33 }
 0x25a   : > { %v1353_v51 = vmax.f32 %v1314_v14, 0.0 }
 0x25b   : > { %v1336_v40 = vmax.f32 %v1272_v16, 0.0 }
 0x25c   : > { %v1371_v44 = vpack.c.bf16 %v1353_v51, %v1352_v35 }
 0x25e   : > { %1515 = vmatmul.bf16.gmra.mxu3 %v1371_v44 }
 0x260   : > { %v1273_v38 = vpop.f32.mrf.mxu0 }
 0x261   : > { %v1274_v0 = vadd.f32 %v3639_v28, %v1273_v38 }
 0x263   : > { %v1337_v24 = vmax.f32 %v1274_v0, 0.0 }
 0x265   : > { %v1363_v1 = vpack.c.bf16 %v1337_v24, %v1336_v40 }
 0x266   : > { %v1316_v39 = vpop.f32.mrf.mxu2 }
 0x267   : > { %1475 = vmatmul.bf16.gmra.mxu1 %v1363_v1  ;;  %v1317_v54 = vadd.f32 %v3639_v28, %v1316_v39 }
 0x269   : > { %v1451_v55 = vpop.f32.mrf.mxu1  ;;  %v1354_v48 = vmax.f32 %v1317_v54, 0.0 }
 0x26a   : > { %v3709_v37 = vadd.f32 %v3706_v23, %v1451_v55 }
 0x26c   : > { %1531 = vmax.xlane.f32.xlu2 %v3709_v37 }
 0x26d   : > { %v1491_v62 = vpop.f32.mrf.mxu3 }
 0x26e   : > { %v1318_v11 = vpop.f32.mrf.mxu2  ;;  %v3715_v7 = vadd.f32 %v3706_v23, %v1491_v62 }
 0x26f   : > { %v1319_v22 = vadd.f32 %v3639_v28, %v1318_v11 }
 0x271   : > { %v1355_v58 = vmax.f32 %v1319_v22, 0.0  ;;  %v1453_v4 = vpop.f32.mrf.mxu1 }
 0x272   : > { %v1276_v32 = vpop.f32.mrf.mxu0  ;;  %v3718_v18 = vadd.f32 %v3706_v23, %v1453_v4 }
 0x273   : > { %v1372_v9 = vpack.c.bf16 %v1355_v58, %v1354_v48  ;;  %v1277_v63 = vadd.f32 %v3639_v28, %v1276_v32 }
 0x274   : > { %1533 = vmax.xlane.f32.xlu0 %v3718_v18  ;;  %1563 = vmax.xlane.f32.xlu2 %v3715_v7 }
 0x275   : > { %1520 = vmatmul.bf16.gmra.mxu3 %v1372_v9  ;;  %v1493_v31 = vpop.f32.mrf.mxu3  ;;  %v1338_v29 = vmax.f32 %v1277_v63, 0.0 }
 0x276   : > { %v3724_v26 = vadd.f32 %v3706_v23, %v1493_v31 }
 0x27a   : > { %v1278_v43 = vpop.f32.mrf.mxu0 }
 0x27b   : > { %v1279_v59 = vadd.f32 %v3639_v28, %v1278_v43  ;;  %v1456_v25 = vpop.f32.mrf.mxu1 }
 0x27c   : > { %v3728_v49 = vadd.f32 %v3706_v23, %v1456_v25  ;;  %1565 = vmax.xlane.f32.xlu0 %v3724_v26 }
 0x27d   : > { %v1339_v52 = vmax.f32 %v1279_v59, 0.0 }
 0x27e   : > { %1535 = vmax.xlane.f32.xlu1 %v3728_v49 }
 0x27f   : > { %v1364_v8 = vpack.c.bf16 %v1339_v52, %v1338_v29 }
 0x280   : > { %v1496_v56 = vpop.f32.mrf.mxu3 }
 0x281   : > { %1480 = vmatmul.bf16.gmra.mxu1 %v1364_v8  ;;  %v3733_v47 = vadd.f32 %v3706_v23, %v1496_v56 }
 0x283   : > { %v1321_v2 = vpop.f32.mrf.mxu2  ;;  %v1458_v21 = vpop.f32.mrf.mxu1 }
 0x284   : > { %v3736_v57 = vadd.f32 %v3706_v23, %v1458_v21  ;;  %v1322_v42 = vadd.f32 %v3639_v28, %v1321_v2 }
 0x286   : > { %1537 = vmax.xlane.f32.xlu2 %v3736_v57  ;;  %1567 = vmax.xlane.f32.xlu1 %v3733_v47  ;;  %v1356_v15 = vmax.f32 %v1322_v42, 0.0 }
 0x288   : > { %v1498_v19 = vpop.f32.mrf.mxu3 }
 0x289   : > { %v3749_v41 = vadd.f32 %v3706_v23, %v1498_v19 }
 0x28b   : > { %v1323_v3 = vpop.f32.mrf.mxu2 }
 0x28c   : > { %v1324_v5 = vadd.f32 %v3639_v28, %v1323_v3  ;;  %v1281_v61 = vpop.f32.mrf.mxu0 }
 0x28d   : > { %v1282_v17 = vadd.f32 %v3639_v28, %v1281_v61 }
 0x28e   : > { %v1357_v46 = vmax.f32 %v1324_v5, 0.0 }
 0x28f   : > { %v1340_v45 = vmax.f32 %v1282_v17, 0.0 }
 0x290   : > { %v1373_v27 = vpack.c.bf16 %v1357_v46, %v1356_v15 }
 0x292   : > { %1525 = vmatmul.bf16.gmra.mxu3 %v1373_v27 }
 0x294   : > { %v1283_v30 = vpop.f32.mrf.mxu0 }
 0x295   : > { %v1284_v12 = vadd.f32 %v3639_v28, %v1283_v30 }
 0x296   : > { %v1461_v60 = vpop.f32.mrf.mxu1 }
 0x297   : > { %v1341_v20 = vmax.f32 %v1284_v12, 0.0  ;;  %v3745_v36 = vadd.f32 %v3706_v23, %v1461_v60 }
 0x299   : > { %1539 = vmax.xlane.f32.xlu2 %v3745_v36  ;;  %v1365_v50 = vpack.c.bf16 %v1341_v20, %v1340_v45 }
 0x29a   : > { %v1501_v28 = vpop.f32.mrf.mxu3 }
 0x29b   : > { %1485 = vmatmul.bf16.gmra.mxu1 %v1365_v50  ;;  %v3757_v6 = vadd.f32 %v3706_v23, %v1501_v28 }
 0x29e   : > { %v1463_v13 = vpop.f32.mrf.mxu1 }
 0x29f   : > { %v3752_v10 = vadd.f32 %v3706_v23, %v1463_v13 }
 0x2a1   : > { %1541 = vmax.xlane.f32.xlu0 %v3752_v10  ;;  %1569 = vmax.xlane.f32.xlu2 %v3749_v41 }
 0x2a2   : > { %v1503_v14 = vpop.f32.mrf.mxu3 }
 0x2a3   : > { %v3765_v35 = vadd.f32 %v3706_v23, %v1503_v14 }
 0x2a9   : > { %1571 = vmax.xlane.f32.xlu0 %v3757_v6 }
 0x2ad   : > { %v1506_v44 = vpop.f32.mrf.mxu3 }
 0x2ae   : > { %v3773_v16 = vadd.f32 %v3706_v23, %v1506_v44 }
 0x2b0   : > { %v1466_v53 = vpop.f32.mrf.mxu1 }
 0x2b1   : > { %v3761_v34 = vadd.f32 %v3706_v23, %v1466_v53 }
 0x2b3   : > { %1543 = vmax.xlane.f32.xlu1 %v3761_v34 }
 0x2b5   : > { %v1508_v40 = vpop.f32.mrf.mxu3 }
 0x2b6   : > { %v3781_v1 = vadd.f32 %v3706_v23, %v1508_v40 }
 0x2b8   : > { %v1468_v33 = vpop.f32.mrf.mxu1 }
 0x2b9   : > { %v3768_v51 = vadd.f32 %v3706_v23, %v1468_v33 }
 0x2bb   : > { %1545 = vmax.xlane.f32.xlu2 %v3768_v51  ;;  %1573 = vmax.xlane.f32.xlu1 %v3765_v35 }
 0x2c3   : > { %1575 = vmax.xlane.f32.xlu2 %v3773_v16 }
 0x2c4   : > { %v1511_v55 = vpop.f32.mrf.mxu3 }
 0x2c5   : > { %v3789_v54 = vadd.f32 %v3706_v23, %v1511_v55 }
 0x2ca   : > { %v1471_v38 = vpop.f32.mrf.mxu1 }
 0x2cb   : > { %v3777_v0 = vadd.f32 %v3706_v23, %v1471_v38 }
 0x2cc   : > { %v1513_v22 = vpop.f32.mrf.mxu3 }
 0x2cd   : > { %1547 = vmax.xlane.f32.xlu0 %v3777_v0  ;;  %v3797_v58 = vadd.f32 %v3706_v23, %v1513_v22 }
 0x2d2   : > { %v1473_v24 = vpop.f32.mrf.mxu1 }
 0x2d3   : > { %v3784_v39 = vadd.f32 %v3706_v23, %v1473_v24 }
 0x2d5   : > { %1549 = vmax.xlane.f32.xlu1 %v3784_v39  ;;  %1577 = vmax.xlane.f32.xlu0 %v3781_v1 }
 0x2dd   : > { %1579 = vmax.xlane.f32.xlu1 %v3789_v54 }
 0x2df   : > { %v1532_v56 = vpop.xlane.xlu2 %1531 }
 0x2e0   : > { %v1595_v27 = vsub.f32 %v3709_v37, %v1532_v56 }
 0x2e1   : > { %v1516_v32 = vpop.f32.mrf.mxu3 }
 0x2e2   : > { %v3805_v9 = vadd.f32 %v3706_v23, %v1516_v32  ;;  %v1627_v45 = vmul.f32 1.442695, %v1595_v27 }
 0x2e4   : > { %v1476_v62 = vpop.f32.mrf.mxu1 }
 0x2e5   : > { %v3793_v11 = vadd.f32 %v3706_v23, %v1476_v62 }
 0x2e7   : > { %1551 = vmax.xlane.f32.xlu2 %v3793_v11  ;;  %v1534_v21 = vpop.xlane.xlu0 %1533  ;;  %v1564_v61 = vpop.xlane.xlu2 %1563 }
 0x2e8   : > { %v1596_v37 = vsub.f32 %v3718_v18, %v1534_v21  ;;  %v1611_v55 = vsub.f32 %v3715_v7, %v1564_v61 }
 0x2e9   : > { %v1518_v31 = vpop.f32.mrf.mxu3 }
 0x2ea   : > { %v3813_v29 = vadd.f32 %v3706_v23, %v1518_v31  ;;  %v1629_v33 = vmul.f32 1.442695, %v1596_v37 }
 0x2ec   : > { %v1478_v48 = vpop.f32.mrf.mxu1 }
 0x2ed   : > { %v3800_v4 = vadd.f32 %v3706_v23, %v1478_v48 }
 0x2ef   : > { %1553 = vmax.xlane.f32.xlu0 %v3800_v4  ;;  %1581 = vmax.xlane.f32.xlu2 %v3797_v58  ;;  %v1566_v17 = vpop.xlane.xlu0 %1565 }
 0x2f0   : > { %v1612_v50 = vsub.f32 %v3724_v26, %v1566_v17 }
 0x2f1   : > { %v1536_v3 = vpop.xlane.xlu1 %1535 }
 0x2f2   : > { %v1597_v15 = vsub.f32 %v3728_v49, %v1536_v3  ;;  %v1661_v14 = vmul.f32 1.442695, %v1612_v50 }
 0x2f4   : > { %v1631_v30 = vmul.f32 1.442695, %v1597_v15 }
 0x2f6   : > { %2672 = vpow2.f32 %v1631_v30 }
 0x2f7   : > { %1583 = vmax.xlane.f32.xlu0 %v3805_v9  ;;  %2674 = vpow2.f32 %v1627_v45 }
 0x2f8   : > { %v1521_v59 = vpop.f32.mrf.mxu3  ;;  %2676 = vpow2.f32 %v1661_v14 }
 0x2f9   : > { %v3821_v2 = vadd.f32 %v3706_v23, %v1521_v59  ;;  %v1538_v49 = vpop.xlane.xlu2 %1537  ;;  %v1568_v44 = vpop.xlane.xlu1 %1567  ;;  %2678 = vpow2.f32 %v1629_v33 }
 0x2fa   : > { %v1598_v28 = vsub.f32 %v3736_v57, %v1538_v49  ;;  %v1613_v57 = vsub.f32 %v3733_v47, %v1568_v44 }
 0x2fc   : > { %v3845_v26 = vpop.eup %2672  ;;  %v1633_v38 = vmul.f32 1.442695, %v1598_v28  ;;  %v1663_v31 = vmul.f32 1.442695, %v1613_v57 }
 0x2fd   : > { %v3852_v24 = vpop.eup %2674 }
 0x2fe   : > { %v1481_v63 = vpop.f32.mrf.mxu1  ;;  %2680 = vpow2.f32 %v1633_v38  ;;  %v3858_v32 = vpop.eup %2676 }
 0x2ff   : > { %v3809_v43 = vadd.f32 %v3706_v23, %v1481_v63  ;;  %v3861_v63 = vpop.eup %2678 }
 0x300   : > { %v1523_v8 = vpop.f32.mrf.mxu3 }
 0x301   : > { %1555 = vmax.xlane.f32.xlu1 %v3809_v43  ;;  %v3836_v19 = vadd.f32 %v3706_v23, %v1523_v8 }
 0x304   : > { %v3864_v59 = vpop.eup %2680 }
 0x306   : > { %v1483_v25 = vpop.f32.mrf.mxu1 }
 0x307   : > { %v3816_v52 = vadd.f32 %v3706_v23, %v1483_v25 }
 0x309   : > { %1557 = vmax.xlane.f32.xlu2 %v3816_v52  ;;  %1585 = vmax.xlane.f32.xlu1 %v3813_v29 }
 0x30c   : > { %v1540_v62 = vpop.xlane.xlu2 %1539 }
 0x30d   : > { %v1599_v47 = vsub.f32 %v3745_v36, %v1540_v62 }
 0x30f   : > { %v1635_v21 = vmul.f32 1.442695, %v1599_v47 }
 0x311   : > { %1587 = vmax.xlane.f32.xlu2 %v3821_v2 }
 0x314   : > { %v1542_v53 = vpop.xlane.xlu0 %1541 }
 0x315   : > { %v1526_v42 = vpop.f32.mrf.mxu3  ;;  %v1600_v40 = vsub.f32 %v3752_v10, %v1542_v53  ;;  %v1659_v10 = vmul.f32 1.442695, %v1611_v55 }
 0x316   : > { %v3850_v18 = vadd.f32 %v3706_v23, %v1526_v42  ;;  %v1570_v42 = vpop.xlane.xlu2 %1569 }
 0x317   : > { %v1637_v22 = vmul.f32 1.442695, %v1600_v40  ;;  %v1614_v61 = vsub.f32 %v3749_v41, %v1570_v42 }
 0x318   : > { %v1486_v5 = vpop.f32.mrf.mxu1 }
 0x319   : > { %v3826_v46 = vadd.f32 %v3706_v23, %v1486_v5  ;;  %2682 = vpow2.f32 %v1637_v22  ;;  %v1665_v27 = vmul.f32 1.442695, %v1614_v61 }
 0x31a   : > { %2684 = vpow2.f32 %v1659_v10 }
 0x31b   : > { %1559 = vmax.xlane.f32.xlu0 %v3826_v46  ;;  %2686 = vpow2.f32 %v1663_v31 }
 0x31c   : > { %v1572_v48 = vpop.xlane.xlu0 %1571 }
 0x31d   : > { %v1528_v12 = vpop.f32.mrf.mxu3  ;;  %v1615_v7 = vsub.f32 %v3757_v6, %v1572_v48 }
 0x31e   : > { %v3831_v60 = vadd.f32 %v3706_v23, %v1528_v12 }
 0x31f   : > { %v1667_v8 = vmul.f32 1.442695, %v1615_v7  ;;  %v3870_v56 = vpop.eup %2682 }
 0x320   : > { %1593 = vmax.xlane.f32.xlu2 %v3831_v60  ;;  %v1488_v20 = vpop.f32.mrf.mxu1  ;;  %v3873_v6 = vpop.eup %2684 }
 0x321   : > { %v3839_v13 = vadd.f32 %v3706_v23, %v1488_v20  ;;  %2688 = vpow2.f32 %v1667_v8  ;;  %v3875_v36 = vpop.eup %2686 }
 0x322   : > { %2690 = vpow2.f32 %v1635_v21 }
 0x323   : > { %1561 = vmax.xlane.f32.xlu1 %v3839_v13  ;;  %1589 = vmax.xlane.f32.xlu0 %v3836_v19 }
 0x326   : > { %v1544_v23 = vpop.xlane.xlu1 %1543 }
 0x327   : > { %v1601_v25 = vsub.f32 %v3761_v34, %v1544_v23  ;;  %v3881_v15 = vpop.eup %2688 }
 0x328   : > { %1695 = vadd.xlane.f32.xlu2 %v3845_v26  ;;  %v3884_v45 = vpop.eup %2690 }
 0x329   : > { %v1639_v3 = vmul.f32 1.442695, %v1601_v25 }
 0x32b   : > { %1591 = vmax.xlane.f32.xlu1 %v3850_v18  ;;  %1691 = vadd.xlane.f32.xlu0 %v3852_v24  ;;  %2692 = vpow2.f32 %v1639_v3 }
 0x32c   : > { %2694 = vpow2.f32 %v1665_v27 }
 0x32e   : > { %v1574_v5 = vpop.xlane.xlu1 %1573  ;;  %v1546_v17 = vpop.xlane.xlu2 %1545 }
 0x32f   : > { %v1616_v34 = vsub.f32 %v3765_v35, %v1574_v5  ;;  %v1602_v35 = vsub.f32 %v3768_v51, %v1546_v17 }
 0x330   : > { %1725 = vadd.xlane.f32.xlu2 %v3858_v32 }
 0x331   : > { %v1669_v30 = vmul.f32 1.442695, %v1616_v34  ;;  %v3887_v41 = vpop.eup %2692  ;;  %v1641_v49 = vmul.f32 1.442695, %v1602_v35 }
 0x332   : > { %v3892_v53 = vpop.eup %2694 }
 0x333   : > { %1697 = vadd.xlane.f32.xlu0 %v3864_v59  ;;  %1693 = vadd.xlane.f32.xlu1 %v3861_v63  ;;  %2696 = vpow2.f32 %v1669_v30 }
 0x336   : > { %v1576_v14 = vpop.xlane.xlu2 %1575 }
 0x337   : > { %v1617_v51 = vsub.f32 %v3773_v16, %v1576_v14 }
 0x338   : > { %1701 = vadd.xlane.f32.xlu2 %v3870_v56 }
 0x339   : > { %v3896_v44 = vpop.eup %2696 }
 0x33b   : > { %1727 = vadd.xlane.f32.xlu0 %v3875_v36  ;;  %1723 = vadd.xlane.f32.xlu1 %v3873_v6 }
 0x340   : > { %1731 = vadd.xlane.f32.xlu2 %v3881_v15  ;;  %v1548_v12 = vpop.xlane.xlu0 %1547 }
 0x341   : > { %v1603_v20 = vsub.f32 %v3777_v0, %v1548_v12 }
 0x343   : > { %v1643_v50 = vmul.f32 1.442695, %v1603_v20  ;;  %1703 = vadd.xlane.f32.xlu0 %v3887_v41  ;;  %1699 = vadd.xlane.f32.xlu1 %v3884_v45 }
 0x345   : > { %2698 = vpow2.f32 %v1643_v50 }
 0x346   : > { %2700 = vpow2.f32 %v1641_v49 }
 0x348   : > { %v1550_v37 = vpop.xlane.xlu1 %1549  ;;  %v1578_v28 = vpop.xlane.xlu0 %1577 }
 0x349   : > { %v1604_v0 = vsub.f32 %v3784_v39, %v1550_v37  ;;  %v1618_v33 = vsub.f32 %v3781_v1, %v1578_v28  ;;  %v1671_v39 = vmul.f32 1.442695, %v1617_v51 }
 0x34b   : > { %v3898_v38 = vpop.eup %2698  ;;  %v1645_v40 = vmul.f32 1.442695, %v1604_v0  ;;  %v1673_v55 = vmul.f32 1.442695, %v1618_v33  ;;  %1733 = vadd.xlane.f32.xlu0 %v3896_v44  ;;  %1729 = vadd.xlane.f32.xlu1 %v3892_v53 }
 0x34c   : > { %1707 = vadd.xlane.f32.xlu2 %v3898_v38  ;;  %v3905_v62 = vpop.eup %2700 }
 0x34d   : > { %2702 = vpow2.f32 %v1645_v40 }
 0x34e   : > { %2704 = vpow2.f32 %v1673_v55 }
 0x34f   : > { %2706 = vpow2.f32 %v1671_v39 }
 0x350   : > { %v1580_v57 = vpop.xlane.xlu1 %1579 }
 0x351   : > { %v1619_v1 = vsub.f32 %v3789_v54, %v1580_v57 }
 0x353   : > { %v3907_v22 = vpop.eup %2702  ;;  %v1675_v48 = vmul.f32 1.442695, %v1619_v1  ;;  %1705 = vadd.xlane.f32.xlu1 %v3905_v62 }
 0x354   : > { %v3910_v10 = vpop.eup %2704  ;;  %1709 = vadd.xlane.f32.xlu0 %v3907_v22 }
 0x355   : > { %2708 = vpow2.f32 %v1675_v48  ;;  %1737 = vadd.xlane.f32.xlu2 %v3910_v10  ;;  %v3914_v16 = vpop.eup %2706 }
 0x35a   : > { %v1552_v23 = vpop.xlane.xlu2 %1551 }
 0x35b   : > { %v3916_v31 = vpop.eup %2708  ;;  %v1605_v54 = vsub.f32 %v3793_v11, %v1552_v23  ;;  %1735 = vadd.xlane.f32.xlu1 %v3914_v16 }
 0x35c   : > { %1739 = vadd.xlane.f32.xlu0 %v3916_v31 }
 0x35d   : > { %v1647_v7 = vmul.f32 1.442695, %v1605_v54 }
 0x35f   : > { %2710 = vpow2.f32 %v1647_v7 }
 0x362   : > { %v1582_v47 = vpop.xlane.xlu2 %1581  ;;  %v1554_v25 = vpop.xlane.xlu0 %1553 }
 0x363   : > { %v1620_v8 = vsub.f32 %v3797_v58, %v1582_v47  ;;  %v1606_v21 = vsub.f32 %v3800_v4, %v1554_v25 }
 0x365   : > { %v3923_v42 = vpop.eup %2710  ;;  %v1677_v3 = vmul.f32 1.442695, %v1620_v8  ;;  %v1649_v5 = vmul.f32 1.442695, %v1606_v21 }
 0x366   : > { %1711 = vadd.xlane.f32.xlu1 %v3923_v42 }
 0x367   : > { %2712 = vpow2.f32 %v1677_v3 }
 0x368   : > { %2714 = vpow2.f32 %v1649_v5 }
 0x36a   : > { %v1584_v11 = vpop.xlane.xlu0 %1583 }
 0x36b   : > { %v1621_v61 = vsub.f32 %v3805_v9, %v1584_v11 }
 0x36d   : > { %v3927_v34 = vpop.eup %2712  ;;  %v1679_v27 = vmul.f32 1.442695, %v1621_v61 }
 0x36e   : > { %v3929_v17 = vpop.eup %2714  ;;  %1741 = vadd.xlane.f32.xlu1 %v3927_v34 }
 0x36f   : > { %2716 = vpow2.f32 %v1679_v27  ;;  %1713 = vadd.xlane.f32.xlu2 %v3929_v17 }
 0x374   : > { %v1556_v58 = vpop.xlane.xlu1 %1555 }
 0x375   : > { %v3933_v4 = vpop.eup %2716  ;;  %v1607_v30 = vsub.f32 %v3809_v43, %v1556_v58 }
 0x377   : > { %v1651_v12 = vmul.f32 1.442695, %v1607_v30  ;;  %1743 = vadd.xlane.f32.xlu2 %v3933_v4 }
 0x379   : > { %2718 = vpow2.f32 %v1651_v12 }
 0x37c   : > { %v1558_v9 = vpop.xlane.xlu2 %1557  ;;  %v1586_v20 = vpop.xlane.xlu1 %1585 }
 0x37d   : > { %v1608_v50 = vsub.f32 %v3816_v52, %v1558_v9  ;;  %v1622_v35 = vsub.f32 %v3813_v29, %v1586_v20 }
 0x37f   : > { %v3939_v49 = vpop.eup %2718  ;;  %v1653_v37 = vmul.f32 1.442695, %v1608_v50  ;;  %v1681_v28 = vmul.f32 1.442695, %v1622_v35 }
 0x380   : > { %1715 = vadd.xlane.f32.xlu0 %v3939_v49 }
 0x381   : > { %2720 = vpow2.f32 %v1653_v37 }
 0x382   : > { %2722 = vpow2.f32 %v1681_v28 }
 0x384   : > { %v1588_v14 = vpop.xlane.xlu2 %1587 }
 0x385   : > { %v1623_v43 = vsub.f32 %v3821_v2, %v1588_v14 }
 0x387   : > { %v3943_v0 = vpop.eup %2720  ;;  %v1683_v33 = vmul.f32 1.442695, %v1623_v43 }
 0x388   : > { %v3945_v40 = vpop.eup %2722  ;;  %1717 = vadd.xlane.f32.xlu1 %v3943_v0 }
 0x389   : > { %2724 = vpow2.f32 %v1683_v33  ;;  %1745 = vadd.xlane.f32.xlu0 %v3945_v40 }
 0x38e   : > { %v1560_v29 = vpop.xlane.xlu0 %1559 }
 0x38f   : > { %v3949_v52 = vpop.eup %2724  ;;  %v1609_v55 = vsub.f32 %v3826_v46, %v1560_v29 }
 0x390   : > { %1747 = vadd.xlane.f32.xlu1 %v3949_v52 }
 0x391   : > { %v1655_v51 = vmul.f32 1.442695, %v1609_v55 }
 0x393   : > { %2726 = vpow2.f32 %v1655_v51  ;;  %v1594_v2 = vpop.xlane.xlu2 %1593 }
 0x394   : > { %v1626_v39 = vsub.f32 %v3831_v60, %v1594_v2 }
 0x396   : > { %v1689_v57 = vmul.f32 1.442695, %v1626_v39  ;;  %v1562_v1 = vpop.xlane.xlu1 %1561  ;;  %v1590_v48 = vpop.xlane.xlu0 %1589 }
 0x397   : > { %v1610_v23 = vsub.f32 %v3839_v13, %v1562_v1  ;;  %v1624_v54 = vsub.f32 %v3836_v19, %v1590_v48 }
 0x398   : > { %2728 = vpow2.f32 %v1689_v57 }
 0x399   : > { %v3956_v7 = vpop.eup %2726  ;;  %v1657_v47 = vmul.f32 1.442695, %v1610_v23  ;;  %v1685_v25 = vmul.f32 1.442695, %v1624_v54 }
 0x39a   : > { %1719 = vadd.xlane.f32.xlu2 %v3956_v7 }
 0x39b   : > { %2730 = vpow2.f32 %v1657_v47  ;;  %v3959_v46 = vpop.xlane.xlu2 %1695 }
 0x39c   : > { %2732 = vpow2.f32 %v1685_v25  ;;  %v1796_v20 = vand.u32 2147483648, %v3959_v46  ;;  %v1794_v14 = vand.u32 2147483647, %v3959_v46  ;;  %vm1790_vm0 = vweird.f32 %v3959_v46 }
 0x39d   : > { %2734 = vrcp.f32 %v3959_v46 }
 0x39e   : > { %v3962_v60 = vpop.eup %2728  ;;  %v1592_v8 = vpop.xlane.xlu1 %1591  ;;  %v1797_v51 = vor.u32 1.1754944e-38, %v1796_v20  ;;  %vm4008_vm3 = vcmp.eq.f32.partialorder %v1794_v14, 8.507059e+37 }
 0x39f   : > { %4677 = vst [vmem:[#allocation5_spill] sm:$0xff] %v3962_v60  ;;  %v1692_v21 = vpop.xlane.xlu0 %1691  ;;  %v1625_v13 = vsub.f32 %v3850_v18, %v1592_v8  ;;  %1753 = vadd.xlane.f32.xlu1 %v3962_v60 }
 0x3a0   : > { %2736 = vrcp.f32 %v1692_v21  ;;  %v1764_v35 = vand.u32 2147483647, %v1692_v21  ;;  %v1766_v37 = vand.u32 2147483648, %v1692_v21  ;;  %vm1760_vm1 = vweird.f32 %v1692_v21 }
 0x3a1   : > { %v3966_v19 = vpop.eup %2730  ;;  %v1687_v3 = vmul.f32 1.442695, %v1625_v13 }
 0x3a2   : > { %v3968_v5 = vpop.eup %2732  ;;  %1721 = vadd.xlane.f32.xlu0 %v3966_v19  ;;  %vm4003_vm2 = vcmp.eq.f32.partialorder %v1764_v35, 8.507059e+37  ;;  %v1767_v1 = vor.u32 1.1754944e-38, %v1766_v37 }
 0x3a3   : > { %v3971_v11 = vpop.eup %2734  ;;  %2738 = vpow2.f32 %v1687_v3  ;;  %1749 = vadd.xlane.f32.xlu2 %v3968_v5  ;;  %v3974_v61 = vpop.xlane.xlu2 %1725 }
 0x3a4   : > { %v1786_v18 = vmul.f32 %v3971_v11, %v3959_v46  ;;  %2740 = vrcp.f32 %v3974_v61  ;;  %v2021_v29 = vand.u32 2147483648, %v3974_v61  ;;  %vm1791_vm5 = vweird.f32 %v3971_v11 }
 0x3a5   : > { %v2019_v8 = vand.u32 2147483647, %v3974_v61  ;;  %vm2015_vm9 = vweird.f32 %v3974_v61  ;;  %vm4051_vm11 = vmor %vm1790_vm0, %vm1791_vm5 }
 0x3a6   : > { %v3979_v27 = vpop.eup %2736  ;;  %v3982_v30 = vpop.xlane.xlu1 %1693  ;;  %v1787_v9 = vsub.f32 1.0, %v1786_v18  ;;  %v4018_v13 = vor.u32 1.1754944e-38, %v2021_v29 }
 0x3a7   : > { %v1756_v58 = vmul.f32 %v3979_v27, %v1692_v21  ;;  %v3984_v12 = vpop.xlane.xlu0 %1697  ;;  %2742 = vrcp.f32 %v3982_v30  ;;  %vm1761_vm4 = vweird.f32 %v3979_v27  ;;  %v1779_v47 = vand.u32 2147483647, %v3982_v30 }
 0x3a8   : > { %2744 = vrcp.f32 %v3984_v12  ;;  %v1788_v55 = vmul.f32 %v3971_v11, %v1787_v9  ;;  %v1781_v25 = vand.u32 2147483648, %v3982_v30  ;;  %vm1775_vm6 = vweird.f32 %v3982_v30  ;;  %vm4029_vm8 = vmor %vm1760_vm1, %vm1761_vm4 }
 0x3a9   : > { %v1757_v50 = vsub.f32 1.0, %v1756_v58  ;;  %v3988_v28 = vpop.eup %2738  ;;  %vm1805_vm7 = vweird.f32 %v3984_v12  ;;  %v1811_v29 = vand.u32 2147483648, %v3984_v12  ;;  %vm4040_vm10 = vcmp.eq.f32.partialorder %v1779_v47, 8.507059e+37 }
 0x3aa   : > { %4678 = vst [vmem:[#allocation6_spill] sm:$0xff] %v3988_v28  ;;  %v3992_v43 = vpop.eup %2740  ;;  %1751 = vadd.xlane.f32.xlu0 %v3988_v28  ;;  %v1789_v9 = vadd.f32 %v3971_v11, %v1788_v55  ;;  %vm4072_vm0 = vcmp.eq.f32.partialorder %v2019_v8, 8.507059e+37 }
 0x3ab   : > { %v1758_v33 = vmul.f32 %v3979_v27, %v1757_v50  ;;  %v2011_v2 = vmul.f32 %v3992_v43, %v3974_v61  ;;  %v4001_v39 = vpop.xlane.xlu2 %1701  ;;  %vm2016_vm13 = vweird.f32 %v3992_v43 }
 0x3ac   : > { %2746 = vrcp.f32 %v4001_v39  ;;  %v1793_v47 = vsel %vm4051_vm11, %v3971_v11, %v1789_v9  ;;  %v1812_v9 = vor.u32 1.1754944e-38, %v1811_v29  ;;  %vm1835_vm4 = vweird.f32 %v4001_v39 }
 0x3ad   : > { %v2743_v48 = vpop.eup %2742  ;;  %v1759_v54 = vadd.f32 %v3979_v27, %v1758_v33  ;;  %v2012_v20 = vsub.f32 1.0, %v2011_v2  ;;  %v1809_v33 = vand.u32 2147483647, %v3984_v12  ;;  %v1782_v2 = vor.u32 1.1754944e-38, %v1781_v25 }
 0x3ae   : > { %v1771_v3 = vmul.f32 %v2743_v48, %v3982_v30  ;;  %v4021_v18 = vpop.xlane.xlu1 %1723  ;;  %v2745_v58 = vpop.eup %2744  ;;  %vm1776_vm12 = vweird.f32 %v2743_v48  ;;  %v1841_v23 = vand.u32 2147483648, %v4001_v39 }
 0x3af   : > { %v4026_v50 = vpop.xlane.xlu0 %1727  ;;  %v1801_v14 = vmul.f32 %v2745_v58, %v3984_v12  ;;  %v1763_v55 = vsel %vm4029_vm8, %v3979_v27, %v1759_v54  ;;  %2748 = vrcp.f32 %v4021_v18  ;;  %v2013_v25 = vmul.f32 %v3992_v43, %v2012_v20  ;;  %vm1777_vm1 = vmor %vm1775_vm6, %vm1776_vm12 }
 0x3b0   : > { %v1772_v37 = vsub.f32 1.0, %v1771_v3  ;;  %2750 = vrcp.f32 %v4026_v50  ;;  %vm1806_vm14 = vweird.f32 %v2745_v58  ;;  %vm4066_vm15 = vcmp.eq.f32.partialorder %v1809_v33, 8.507059e+37 }
 0x3b1   : > { %v1802_v54 = vsub.f32 1.0, %v1801_v14  ;;  %v1768_v11 = vsel %vm4003_vm2, %v1767_v1, %v1763_v55  ;;  %v1798_v33 = vsel %vm4008_vm3, %v1797_v51, %v1793_v47  ;;  %v2014_v30 = vadd.f32 %v3992_v43, %v2013_v25  ;;  %vm1807_vm2 = vmor %vm1805_vm7, %vm1806_vm14 }
 0x3b2   : > { %v4045_v3 = vpop.eup %2746  ;;  %v1773_v27 = vmul.f32 %v2743_v48, %v1772_v37  ;;  %v1799_v21 = vmul.f32 %v3845_v26, %v1798_v33  ;;  %vm4114_vm3 = vmor %vm2015_vm9, %vm2016_vm13  ;;  %v1839_v33 = vand.u32 2147483647, %v4001_v39  ;;  %vm2000_vm8 = vweird.f32 %v4021_v18 }
 0x3b3   : > { %v1831_v46 = vmul.f32 %v4045_v3, %v4001_v39  ;;  %v4064_v35 = vpop.xlane.xlu2 %1731  ;;  %v1803_v60 = vmul.f32 %v2745_v58, %v1802_v54  ;;  %v2018_v14 = vsel %vm4114_vm3, %v3992_v43, %v2014_v30  ;;  %vm1836_vm5 = vweird.f32 %v4045_v3 }
 0x3b4   : > { %v1774_v37 = vadd.f32 %v2743_v48, %v1773_v27  ;;  %2752 = vrcp.f32 %v4064_v35  ;;  %v1842_v43 = vor.u32 1.1754944e-38, %v1841_v23  ;;  %v2023_v30 = vsel %vm4072_vm0, %v4018_v13, %v2018_v14  ;;  %vm4144_vm7 = vmor %vm1835_vm4, %vm1836_vm5 }
 0x3b5   : > { %v1832_v20 = vsub.f32 1.0, %v1831_v46  ;;  %v1804_v1 = vadd.f32 %v2745_v58, %v1803_v60  ;;  %v2749_v55 = vpop.eup %2748  ;;  %v1769_v60 = vmul.f32 %v3852_v24, %v1768_v11  ;;  %vm1840_vm12 = vcmp.eq.f32.partialorder %v1839_v33, 8.507059e+37 }
 0x3b6   : > { %v1778_v57 = vsel %vm1777_vm1, %v2743_v48, %v1774_v37  ;;  %v4087_v8 = vpop.xlane.xlu1 %1699  ;;  %v4097_v48 = vpop.eup %2750  ;;  %v1996_v47 = vmul.f32 %v2749_v55, %v4021_v18  ;;  %v2006_v37 = vand.u32 2147483648, %v4021_v18  ;;  %vm2001_vm6 = vweird.f32 %v2749_v55 }
 0x3b7   : > { %v1783_v29 = vsel %vm4040_vm10, %v1782_v2, %v1778_v57  ;;  %v1833_v51 = vmul.f32 %v4045_v3, %v1832_v20  ;;  %v1808_v54 = vsel %vm1807_vm2, %v2745_v58, %v1804_v1  ;;  %v2004_v2 = vand.u32 2147483647, %v4021_v18  ;;  %v4108_v46 = vpop.xlane.xlu0 %1703  ;;  %vm2002_vm10 = vmor %vm2000_vm8, %vm2001_vm6 }
 0x3b8   : > { %v1784_v27 = vmul.f32 %v3861_v63, %v1783_v29  ;;  %v1813_v12 = vsel %vm4066_vm15, %v1812_v9, %v1808_v54  ;;  %v2026_v25 = vmul.f32 %v4097_v48, %v4026_v50  ;;  %v1997_v58 = vsub.f32 1.0, %v1996_v47 }
 0x3b9   : > { %v1814_v26 = vmul.f32 %v3864_v59, %v1813_v12  ;;  %v1834_v11 = vadd.f32 %v4045_v3, %v1833_v51  ;;  %2754 = vrcp.f32 %v4087_v8  ;;  %vm2005_vm9 = vcmp.eq.f32.partialorder %v2004_v2, 8.507059e+37 }
 0x3ba   : > { %v2473_v63 = vpack.c.bf16 %v1784_v27, %v1769_v60  ;;  %v2027_v9 = vsub.f32 1.0, %v2026_v25  ;;  %v4125_v61 = vpop.eup %2752  ;;  %v1998_v20 = vmul.f32 %v2749_v55, %v1997_v58  ;;  %v2007_v13 = vor.u32 1.1754944e-38, %v2006_v37 }
 0x3bb   : > { %v2478_v59 = vpack.c.bf16 %v1814_v26, %v1799_v21  ;;  %v2056_v1 = vmul.f32 %v4125_v61, %v4064_v35  ;;  %v1838_v28 = vsel %vm4144_vm7, %v4045_v3, %v1834_v11  ;;  %v2034_v60 = vand.u32 2147483647, %v4026_v50 }
 0x3bc   : > { %2474 = vst [vmem:[%s4128_s18] sm:$0xff] %v2473_v63   ;;  %v2028_v57 = vmul.f32 %v4097_v48, %v2027_v9  ;;  %v1999_v51 = vadd.f32 %v2749_v55, %v1998_v20  ;;  %vm2031_vm11 = vweird.f32 %v4097_v48  ;;  %2756 = vrcp.f32 %v4108_v46 }
 0x3bd   : > { %2550 = vst [vmem:[%s4128_s18 + $0x8] sm:$0xff] %v2478_v59   ;;  %v2057_v27 = vsub.f32 1.0, %v2056_v1  ;;  %v2024_v18 = vmul.f32 %v3858_v32, %v2023_v30  ;;  %v2036_v21 = vand.u32 2147483648, %v4026_v50  ;;  %v1843_v3 = vsel %vm1840_vm12, %v1842_v43, %v1838_v28 }
 0x3be   : > { %v4149_v23 = vpop.xlane.xlu1 %1729  ;;  %v2003_v39 = vsel %vm2002_vm10, %v2749_v55, %v1999_v51  ;;  %v2029_v54 = vadd.f32 %v4097_v48, %v2028_v57  ;;  %vm2030_vm13 = vweird.f32 %v4026_v50  ;;  %vm4167_vm15 = vcmp.eq.f32.partialorder %v2034_v60, 8.507059e+37 }
 0x3bf   : > { %v2008_v47 = vsel %vm2005_vm9, %v2007_v13, %v2003_v39  ;;  %v2755_v12 = vpop.eup %2754  ;;  %v2058_v55 = vmul.f32 %v4125_v61, %v2057_v27  ;;  %vm4163_vm14 = vmor %vm2030_vm13, %vm2031_vm11  ;;  %vm2060_vm0 = vweird.f32 %v4064_v35  ;;  %v2064_v32 = vand.u32 2147483647, %v4064_v35  ;;  %v4183_v59 = vpop.xlane.xlu2 %1707 }
 0x3c0   : > { %v2009_v2 = vmul.f32 %v3873_v6, %v2008_v47  ;;  %v1816_v63 = vmul.f32 %v2755_v12, %v4087_v8  ;;  %v4174_v6 = vpop.xlane.xlu0 %1733  ;;  %v2033_v26 = vsel %vm4163_vm14, %v4097_v48, %v2029_v54  ;;  %v2066_v58 = vand.u32 2147483648, %v4064_v35 }
 0x3c1   : > { %2758 = vrcp.f32 %v4149_v23  ;;  %v1844_v37 = vmul.f32 %v3870_v56, %v1843_v3  ;;  %v2037_v14 = vor.u32 1.1754944e-38, %v2036_v21  ;;  %v1824_v9 = vand.u32 2147483647, %v4087_v8 }
 0x3c2   : > { %v2513_v50 = vpack.c.bf16 %v2024_v18, %v2009_v2  ;;  %v1817_v11 = vsub.f32 1.0, %v1816_v63  ;;  %v4185_v20 = vpop.eup %2756  ;;  %v2059_v33 = vadd.f32 %v4125_v61, %v2058_v55  ;;  %vm2061_vm1 = vweird.f32 %v4125_v61 }
 0x3c3   : > { %v1826_v48 = vand.u32 2147483648, %v4087_v8  ;;  %2760 = vrcp.f32 %v4174_v6  ;;  %v2038_v56 = vsel %vm4167_vm15, %v2037_v14, %v2033_v26  ;;  %vm1821_vm4 = vweird.f32 %v2755_v12  ;;  %vm4206_vm5 = vmor %vm2060_vm0, %vm2061_vm1 }
 0x3c4   : > { %2557 = vst [vmem:[%s4128_s18 + $0x40] sm:$0xff] %v2513_v50   ;;  %v1818_v43 = vmul.f32 %v2755_v12, %v1817_v11  ;;  %v1846_v57 = vmul.f32 %v4185_v20, %v4108_v46  ;;  %vm4198_vm2 = vcmp.eq.f32.partialorder %v2064_v32, 8.507059e+37  ;;  %v2067_v29 = vor.u32 1.1754944e-38, %v2066_v58 }
 0x3c5   : > { %vm1820_vm3 = vweird.f32 %v4087_v8  ;;  %v1854_v51 = vand.u32 2147483647, %v4108_v46  ;;  %vm1825_vm6 = vcmp.eq.f32.partialorder %v1824_v9, 8.507059e+37  ;;  %2762 = vrcp.f32 %v4183_v59 }
 0x3c6   : > { %v4196_v1 = vpop.xlane.xlu1 %1705  ;;  %v1819_v13 = vadd.f32 %v2755_v12, %v1818_v43  ;;  %v1847_v60 = vsub.f32 1.0, %v1846_v57  ;;  %v4212_v39 = vmul.f32 %v3875_v36, %v2038_v56  ;;  %v2063_v8 = vsel %vm4206_vm5, %v4125_v61, %v2059_v33  ;;  %vm1822_vm7 = vmor %vm1820_vm3, %vm1821_vm4 }
 0x3c7   : > { %v2759_v27 = vpop.eup %2758  ;;  %v1827_v35 = vor.u32 1.1754944e-38, %v1826_v48  ;;  %vm1850_vm8 = vweird.f32 %v4108_v46  ;;  %v1856_v54 = vand.u32 2147483648, %v4108_v46  ;;  %vm2045_vm9 = vweird.f32 %v4149_v23 }
 0x3c8   : > { %v1823_v18 = vsel %vm1822_vm7, %v2755_v12, %v1819_v13  ;;  %v2041_v47 = vmul.f32 %v2759_v27, %v4149_v23  ;;  %v2049_v21 = vand.u32 2147483647, %v4149_v23  ;;  %v1848_v2 = vmul.f32 %v4185_v20, %v1847_v60  ;;  %v4239_v9 = vpop.xlane.xlu2 %1737  ;;  %v4241_v33 = vpop.xlane.xlu0 %1709 }
 0x3c9   : > { %v2761_v36 = vpop.eup %2760  ;;  %v1828_v3 = vsel %vm1825_vm6, %v1827_v35, %v1823_v18  ;;  %v2051_v61 = vand.u32 2147483648, %v4149_v23  ;;  %2764 = vrcp.f32 %v4196_v1  ;;  %v2068_v55 = vsel %vm4198_vm2, %v2067_v29, %v2063_v8 }
 0x3ca   : > { %v1829_v25 = vmul.f32 %v3884_v45, %v1828_v3  ;;  %v2042_v12 = vsub.f32 1.0, %v2041_v47  ;;  %v2071_v24 = vmul.f32 %v2761_v36, %v4174_v6  ;;  %v1857_v32 = vor.u32 1.1754944e-38, %v1856_v54 }
 0x3cb   : > { %vm2075_vm10 = vweird.f32 %v4174_v6  ;;  %v2079_v63 = vand.u32 2147483647, %v4174_v6  ;;  %v2081_v50 = vand.u32 2147483648, %v4174_v6  ;;  %v4233_v26 = vpop.eup %2762  ;;  %vm4235_vm11 = vcmp.eq.f32.partialorder %v1854_v51, 8.507059e+37 }
 0x3cc   : > { %v2483_v58 = vpack.c.bf16 %v1844_v37, %v1829_v25  ;;  %v2043_v11 = vmul.f32 %v2759_v27, %v2042_v12  ;;  %vm2046_vm12 = vweird.f32 %v2759_v27  ;;  %v2072_v45 = vsub.f32 1.0, %v2071_v24 }
 0x3cd   : > { %v2069_v48 = vmul.f32 %v3881_v15, %v2068_v55  ;;  %v1849_v56 = vadd.f32 %v4185_v20, %v1848_v2  ;;  %vm1851_vm13 = vweird.f32 %v4185_v20  ;;  %v1876_v37 = vmul.f32 %v4233_v26, %v4183_v59  ;;  %vm2047_vm0 = vmor %vm2045_vm9, %vm2046_vm12 }
 0x3ce   : > { %2551 = vst [vmem:[%s4128_s18 + $0x10] sm:$0xff] %v2483_v58   ;;  %v2044_v43 = vadd.f32 %v2759_v27, %v2043_v11  ;;  %vm4249_vm14 = vcmp.eq.f32.partialorder %v2049_v21, 8.507059e+37  ;;  %v2073_v30 = vmul.f32 %v2761_v36, %v2072_v45  ;;  %vm2076_vm15 = vweird.f32 %v2761_v36  ;;  %v4253_v29 = vpop.xlane.xlu1 %1735  ;;  %vm4265_vm4 = vmor %vm1850_vm8, %vm1851_vm13 }
 0x3cf   : > { %v2765_v51 = vpop.eup %2764  ;;  %v2052_v15 = vor.u32 1.1754944e-38, %v2051_v61  ;;  %vm4258_vm1 = vcmp.eq.f32.partialorder %v2079_v63, 8.507059e+37  ;;  %v1877_v13 = vsub.f32 1.0, %v1876_v37  ;;  %2766 = vrcp.f32 %v4239_v9  ;;  %vm2077_vm2 = vmor %vm2075_vm10, %vm2076_vm15 }
 0x3d0   : > { %v2048_v8 = vsel %vm2047_vm0, %v2759_v27, %v2044_v43  ;;  %v2074_v35 = vadd.f32 %v2761_v36, %v2073_v30  ;;  %v2082_v54 = vor.u32 1.1754944e-38, %v2081_v50  ;;  %v1861_v23 = vmul.f32 %v2765_v51, %v4196_v1 }
 0x3d1   : > { %v1853_v18 = vsel %vm4265_vm4, %v4185_v20, %v1849_v56  ;;  %v2053_v47 = vsel %vm4249_vm14, %v2052_v15, %v2048_v8  ;;  %vm1880_vm3 = vweird.f32 %v4183_v59  ;;  %v1884_v46 = vand.u32 2147483647, %v4183_v59 }
 0x3d2   : > { %v1886_v27 = vand.u32 2147483648, %v4183_v59  ;;  %v2054_v21 = vmul.f32 %v3892_v53, %v2053_v47  ;;  %v2078_v3 = vsel %vm2077_vm2, %v2761_v36, %v2074_v35  ;;  %v1862_v2 = vsub.f32 1.0, %v1861_v23 }
 0x3d3   : > { %2768 = vrcp.f32 %v4241_v33  ;;  %v2083_v20 = vsel %vm4258_vm1, %v2082_v54, %v2078_v3  ;;  %v1878_v61 = vmul.f32 %v4233_v26, %v1877_v13  ;;  %v1869_v6 = vand.u32 2147483647, %v4196_v1 }
 0x3d4   : > { %v1871_v55 = vand.u32 2147483648, %v4196_v1  ;;  %v2518_v25 = vpack.c.bf16 %v2054_v21, %v4212_v39  ;;  %v2084_v12 = vmul.f32 %v3896_v44, %v2083_v20  ;;  %v1863_v24 = vmul.f32 %v2765_v51, %v1862_v2 }
 0x3d5   : > { %vm1866_vm5 = vweird.f32 %v2765_v51  ;;  %v4290_v53 = vpop.eup %2766  ;;  %v1858_v36 = vsel %vm4235_vm11, %v1857_v32, %v1853_v18  ;;  %vm4294_vm6 = vcmp.eq.f32.partialorder %v1884_v46, 8.507059e+37  ;;  %vm1865_vm7 = vweird.f32 %v4196_v1  ;;  %v4305_v32 = vpop.xlane.xlu0 %1739 }
 0x3d6   : > { %v2109_v50 = vand.u32 2147483647, %v4239_v9  ;;  %2770 = vrcp.f32 %v4253_v29  ;;  %2558 = vst [vmem:[%s4128_s18 + $0x48] sm:$0xff] %v2518_v25   ;;  %v2523_v44 = vpack.c.bf16 %v2084_v12, %v2069_v48  ;;  %v1864_v39 = vadd.f32 %v2765_v51, %v1863_v24  ;;  %vm1867_vm9 = vmor %vm1865_vm7, %vm1866_vm5 }
 0x3d7   : > { %v2101_v58 = vmul.f32 %v4290_v53, %v4239_v9  ;;  %v2111_v14 = vand.u32 2147483648, %v4239_v9  ;;  %v1879_v45 = vadd.f32 %v4233_v26, %v1878_v61  ;;  %vm1881_vm8 = vweird.f32 %v4233_v26 }
 0x3d8   : > { %v1887_v1 = vor.u32 1.1754944e-38, %v1886_v27  ;;  %v1872_v56 = vor.u32 1.1754944e-38, %v1871_v55  ;;  %v1859_v48 = vmul.f32 %v3887_v41, %v1858_v36  ;;  %2559 = vst [vmem:[%s4128_s18 + $0x50] sm:$0xff] %v2523_v44   ;;  %v1868_v43 = vsel %vm1867_vm9, %v2765_v51, %v1864_v39  ;;  %vm4319_vm12 = vmor %vm1880_vm3, %vm1881_vm8 }
 0x3d9   : > { %v4307_v11 = vpop.xlane.xlu1 %1711  ;;  %v2769_v37 = vpop.eup %2768  ;;  %vm1870_vm10 = vcmp.eq.f32.partialorder %v1869_v6, 8.507059e+37  ;;  %v2102_v57 = vsub.f32 1.0, %v2101_v58  ;;  %vm2105_vm11 = vweird.f32 %v4239_v9  ;;  %2772 = vrcp.f32 %v4305_v32 }
 0x3da   : > { %v1873_v30 = vsel %vm1870_vm10, %v1872_v56, %v1868_v43  ;;  %v1891_v15 = vmul.f32 %v2769_v37, %v4241_v33  ;;  %vm4325_vm13 = vcmp.eq.f32.partialorder %v2109_v50, 8.507059e+37  ;;  %v2112_v60 = vor.u32 1.1754944e-38, %v2111_v14 }
 0x3db   : > { %v1874_v13 = vmul.f32 %v3905_v62, %v1873_v30  ;;  %v2103_v41 = vmul.f32 %v4290_v53, %v2102_v57  ;;  %v1883_v35 = vsel %vm4319_vm12, %v4233_v26, %v1879_v45  ;;  %vm2106_vm14 = vweird.f32 %v4290_v53 }
 0x3dc   : > { %v2771_v8 = vpop.eup %2770  ;;  %v1892_v59 = vsub.f32 1.0, %v1891_v15  ;;  %v1899_v54 = vand.u32 2147483647, %v4241_v33  ;;  %v1901_v18 = vand.u32 2147483648, %v4241_v33  ;;  %vm1896_vm15 = vweird.f32 %v2769_v37  ;;  %vm4344_vm0 = vmor %vm2105_vm11, %vm2106_vm14 }
 0x3dd   : > { %v2488_v23 = vpack.c.bf16 %v1874_v13, %v1859_v48  ;;  %v2104_v62 = vadd.f32 %v4290_v53, %v2103_v41  ;;  %v2086_v47 = vmul.f32 %v2771_v8, %v4253_v29  ;;  %v2094_v27 = vand.u32 2147483647, %v4253_v29 }
 0x3de   : > { %v1893_v46 = vmul.f32 %v2769_v37, %v1892_v59  ;;  %2774 = vrcp.f32 %v4307_v11  ;;  %v1888_v26 = vsel %vm4294_vm6, %v1887_v1, %v1883_v35  ;;  %vm1895_vm1 = vweird.f32 %v4241_v33 }
 0x3df   : > { %2552 = vst [vmem:[%s4128_s18 + $0x18] sm:$0xff] %v2488_v23   ;;  %v2087_v3 = vsub.f32 1.0, %v2086_v47  ;;  %vm2090_vm4 = vweird.f32 %v4253_v29  ;;  %v4352_v20 = vpop.eup %2772  ;;  %v2108_v61 = vsel %vm4344_vm0, %v4290_v53, %v2104_v62  ;;  %v2096_v9 = vand.u32 2147483648, %v4253_v29  ;;  %vm1897_vm2 = vmor %vm1895_vm1, %vm1896_vm15 }
 0x3e0   : > { %v1894_v6 = vadd.f32 %v2769_v37, %v1893_v46  ;;  %v1902_v33 = vor.u32 1.1754944e-38, %v1901_v18  ;;  %vm2091_vm3 = vweird.f32 %v2771_v8  ;;  %v2116_v12 = vmul.f32 %v4352_v20, %v4305_v32 }
 0x3e1   : > { %v4350_v2 = vpop.xlane.xlu1 %1741  ;;  %v2088_v25 = vmul.f32 %v2771_v8, %v2087_v3  ;;  %v1889_v24 = vmul.f32 %v3898_v38, %v1888_v26  ;;  %vm1900_vm5 = vcmp.eq.f32.partialorder %v1899_v54, 8.507059e+37  ;;  %vm4365_vm6 = vcmp.eq.f32.partialorder %v2094_v27, 8.507059e+37  ;;  %vm2092_vm7 = vmor %vm2090_vm4, %vm2091_vm3 }
 0x3e2   : > { %2776 = vrcp.f32 %v4350_v2  ;;  %v4359_v55 = vpop.xlane.xlu2 %1713  ;;  %v1898_v36 = vsel %vm1897_vm2, %v2769_v37, %v1894_v6  ;;  %v2113_v63 = vsel %vm4325_vm13, %v2112_v60, %v2108_v61  ;;  %v2117_v39 = vsub.f32 1.0, %v2116_v12 }
 0x3e3   : > { %v1903_v50 = vsel %vm1900_vm5, %v1902_v33, %v1898_v36  ;;  %v2089_v44 = vadd.f32 %v2771_v8, %v2088_v25  ;;  %v2097_v38 = vor.u32 1.1754944e-38, %v2096_v9  ;;  %v2124_v45 = vand.u32 2147483647, %v4305_v32 }
 0x3e4   : > { %v4371_v58 = vpop.eup %2774  ;;  %v1904_v14 = vmul.f32 %v3907_v22, %v1903_v50  ;;  %2778 = vrcp.f32 %v4359_v55  ;;  %v2118_v56 = vmul.f32 %v4352_v20, %v2117_v39  ;;  %v2126_v37 = vand.u32 2147483648, %v4305_v32 }
 0x3e5   : > { %v2093_v1 = vsel %vm2092_vm7, %v2771_v8, %v2089_v44  ;;  %v1906_v48 = vmul.f32 %v4371_v58, %v4307_v11  ;;  %v2114_v22 = vmul.f32 %v3910_v10, %v2113_v63  ;;  %vm2121_vm8 = vweird.f32 %v4352_v20 }
 0x3e6   : > { %v2493_v57 = vpack.c.bf16 %v1904_v14, %v1889_v24  ;;  %v2098_v29 = vsel %vm4365_vm6, %v2097_v38, %v2093_v1  ;;  %v2119_v15 = vadd.f32 %v4352_v20, %v2118_v56  ;;  %vm2120_vm9 = vweird.f32 %v4305_v32 }
 0x3e7   : > { %v2099_v30 = vmul.f32 %v3914_v16, %v2098_v29  ;;  %v1907_v28 = vsub.f32 1.0, %v1906_v48  ;;  %vm4391_vm10 = vcmp.eq.f32.partialorder %v2124_v45, 8.507059e+37  ;;  %v2139_v8 = vand.u32 2147483647, %v4350_v2  ;;  %vm4397_vm11 = vmor %vm2120_vm9, %vm2121_vm8 }
 0x3e8   : > { %v2777_v43 = vpop.eup %2776  ;;  %2553 = vst [vmem:[%s4128_s18 + $0x20] sm:$0xff] %v2493_v57   ;;  %v2127_v59 = vor.u32 1.1754944e-38, %v2126_v37  ;;  %vm1911_vm12 = vweird.f32 %v4371_v58  ;;  %v2141_v32 = vand.u32 2147483648, %v4350_v2  ;;  %v2123_v23 = vsel %vm4397_vm11, %v4352_v20, %v2119_v15 }
 0x3e9   : > { %v2131_v13 = vmul.f32 %v2777_v43, %v4350_v2  ;;  %v2528_v10 = vpack.c.bf16 %v2114_v22, %v2099_v30  ;;  %v1908_v51 = vmul.f32 %v4371_v58, %v1907_v28  ;;  %vm2136_vm13 = vweird.f32 %v2777_v43 }
 0x3ea   : > { %v2779_v16 = vpop.eup %2778  ;;  %v4403_v54 = vpop.xlane.xlu2 %1743  ;;  %vm1910_vm14 = vweird.f32 %v4307_v11  ;;  %v1914_v46 = vand.u32 2147483647, %v4307_v11  ;;  %v1916_v27 = vand.u32 2147483648, %v4307_v11  ;;  %vm2135_vm15 = vweird.f32 %v4350_v2 }
 0x3eb   : > { %v2132_v60 = vsub.f32 1.0, %v2131_v13  ;;  %2560 = vst [vmem:[%s4128_s18 + $0x58] sm:$0xff] %v2528_v10   ;;  %v1909_v62 = vadd.f32 %v4371_v58, %v1908_v51  ;;  %v1921_v47 = vmul.f32 %v2779_v16, %v4359_v55  ;;  %vm4415_vm0 = vmor %vm1910_vm14, %vm1911_vm12  ;;  %vm2140_vm1 = vcmp.eq.f32.partialorder %v2139_v8, 8.507059e+37 }
 0x3ec   : > { %2780 = vrcp.f32 %v4403_v54  ;;  %v2128_v20 = vsel %vm4391_vm10, %v2127_v59, %v2123_v23  ;;  %vm2137_vm4 = vmor %vm2135_vm15, %vm2136_vm13  ;;  %v2142_v61 = vor.u32 1.1754944e-38, %v2141_v32  ;;  %v1929_v6 = vand.u32 2147483647, %v4359_v55 }
 0x3ed   : > { %v2133_v18 = vmul.f32 %v2777_v43, %v2132_v60  ;;  %v1922_v3 = vsub.f32 1.0, %v1921_v47  ;;  %v1931_v11 = vand.u32 2147483648, %v4359_v55  ;;  %v1913_v2 = vsel %vm4415_vm0, %v4371_v58, %v1909_v62 }
 0x3ee   : > { %vm1926_vm2 = vweird.f32 %v2779_v16  ;;  %vm1915_vm3 = vcmp.eq.f32.partialorder %v1914_v46, 8.507059e+37  ;;  %v1917_v25 = vor.u32 1.1754944e-38, %v1916_v27  ;;  %v2129_v24 = vmul.f32 %v3916_v31, %v2128_v20 }
 0x3ef   : > { %v2134_v21 = vadd.f32 %v2777_v43, %v2133_v18  ;;  %v1923_v33 = vmul.f32 %v2779_v16, %v1922_v3  ;;  %vm1925_vm5 = vweird.f32 %v4359_v55  ;;  %v1932_v44 = vor.u32 1.1754944e-38, %v1931_v11 }
 0x3f0   : > { %v1918_v50 = vsel %vm1915_vm3, %v1917_v25, %v1913_v2  ;;  %vm1927_vm6 = vmor %vm1925_vm5, %vm1926_vm2  ;;  %vm1930_vm7 = vcmp.eq.f32.partialorder %v1929_v6, 8.507059e+37  ;;  %vm2150_vm8 = vweird.f32 %v4403_v54  ;;  %v2156_v28 = vand.u32 2147483648, %v4403_v54 }
 0x3f1   : > { %v2138_v9 = vsel %vm2137_vm4, %v2777_v43, %v2134_v21  ;;  %v1924_v53 = vadd.f32 %v2779_v16, %v1923_v33  ;;  %v1919_v45 = vmul.f32 %v3923_v42, %v1918_v50  ;;  %v2154_v42 = vand.u32 2147483647, %v4403_v54 }
 0x3f2   : > { %v2143_v12 = vsel %vm2140_vm1, %v2142_v61, %v2138_v9  ;;  %v4431_v39 = vpop.eup %2780  ;;  %v2157_v61 = vor.u32 1.1754944e-38, %v2156_v28 }
 0x3f3   : > { %v2144_v36 = vmul.f32 %v3927_v34, %v2143_v12  ;;  %v1716_v63 = vpop.xlane.xlu0 %1715  ;;  %v1928_v14 = vsel %vm1927_vm6, %v2779_v16, %v1924_v53  ;;  %v2146_v34 = vmul.f32 %v4431_v39, %v4403_v54  ;;  %vm2151_vm10 = vweird.f32 %v4431_v39 }
 0x3f4   : > { %2782 = vrcp.f32 %v1716_v63  ;;  %v1933_v38 = vsel %vm1930_vm7, %v1932_v44, %v1928_v14  ;;  %v1946_v30 = vand.u32 2147483648, %v1716_v63  ;;  %vm4447_vm11 = vcmp.eq.f32.partialorder %v2154_v42, 8.507059e+37  ;;  %vm4458_vm14 = vmor %vm2150_vm8, %vm2151_vm10 }
 0x3f5   : > { %v2533_v58 = vpack.c.bf16 %v2144_v36, %v2129_v24  ;;  %v1934_v31 = vmul.f32 %v3929_v17, %v1933_v38  ;;  %v2147_v48 = vsub.f32 1.0, %v2146_v34  ;;  %vm1940_vm12 = vweird.f32 %v1716_v63 }
 0x3f6   : > { %v1944_v16 = vand.u32 2147483647, %v1716_v63  ;;  %v1947_v35 = vor.u32 1.1754944e-38, %v1946_v30 }
 0x3f7   : > { %2561 = vst [vmem:[%s4128_s18 + $0x60] sm:$0xff] %v2533_v58   ;;  %v2498_v55 = vpack.c.bf16 %v1934_v31, %v1919_v45  ;;  %v2148_v29 = vmul.f32 %v4431_v39, %v2147_v48 }
 0x3f8   : > { %vm1945_vm1 = vcmp.eq.f32.partialorder %v1944_v16, 8.507059e+37 }
 0x3f9   : > { %2554 = vst [vmem:[%s4128_s18 + $0x28] sm:$0xff] %v2498_v55   ;;  %v2149_v51 = vadd.f32 %v4431_v39, %v2148_v29 }
 0x3fa   : > { %v2783_v1 = vpop.eup %2782 }
 0x3fb   : > { %v1936_v56 = vmul.f32 %v2783_v1, %v1716_v63  ;;  %v1718_v37 = vpop.xlane.xlu1 %1717  ;;  %vm1941_vm9 = vweird.f32 %v2783_v1  ;;  %v2153_v21 = vsel %vm4458_vm14, %v4431_v39, %v2149_v51 }
 0x3fc   : > { %2784 = vrcp.f32 %v1718_v37  ;;  %v1746_v43 = vpop.xlane.xlu0 %1745  ;;  %vm4451_vm13 = vmor %vm1940_vm12, %vm1941_vm9  ;;  %v1959_v23 = vand.u32 2147483647, %v1718_v37  ;;  %v1961_v62 = vand.u32 2147483648, %v1718_v37  ;;  %vm1955_vm4 = vweird.f32 %v1718_v37 }
 0x3fd   : > { %v1937_v22 = vsub.f32 1.0, %v1936_v56  ;;  %2786 = vrcp.f32 %v1746_v43  ;;  %v2171_v26 = vand.u32 2147483648, %v1746_v43  ;;  %v2169_v20 = vand.u32 2147483647, %v1746_v43 }
 0x3fe   : > { %v1962_v11 = vor.u32 1.1754944e-38, %v1961_v62  ;;  %vm2165_vm3 = vweird.f32 %v1746_v43  ;;  %v2158_v9 = vsel %vm4447_vm11, %v2157_v61, %v2153_v21  ;;  %vm1960_vm5 = vcmp.eq.f32.partialorder %v1959_v23, 8.507059e+37 }
 0x3ff   : > { %v1938_v57 = vmul.f32 %v2783_v1, %v1937_v22  ;;  %v2172_v25 = vor.u32 1.1754944e-38, %v2171_v26  ;;  %vm2170_vm7 = vcmp.eq.f32.partialorder %v2169_v20, 8.507059e+37  ;;  %v2159_v39 = vmul.f32 %v3933_v4, %v2158_v9 }
 0x401   : > { %v1939_v13 = vadd.f32 %v2783_v1, %v1938_v57 }
 0x402   : > { %v2785_v17 = vpop.eup %2784 }
 0x403   : > { %v2787_v15 = vpop.eup %2786  ;;  %v1951_v41 = vmul.f32 %v2785_v17, %v1718_v37  ;;  %v4443_v10 = vpop.xlane.xlu1 %1747  ;;  %v1943_v46 = vsel %vm4451_vm13, %v2783_v1, %v1939_v13  ;;  %vm1956_vm15 = vweird.f32 %v2785_v17 }
 0x404   : > { %v2161_v8 = vmul.f32 %v2787_v15, %v1746_v43  ;;  %2788 = vrcp.f32 %v4443_v10  ;;  %vm2166_vm0 = vweird.f32 %v2787_v15  ;;  %v1948_v6 = vsel %vm1945_vm1, %v1947_v35, %v1943_v46  ;;  %vm1957_vm2 = vmor %vm1955_vm4, %vm1956_vm15 }
 0x405   : > { %v1952_v59 = vsub.f32 1.0, %v1951_v41  ;;  %vm2167_vm6 = vmor %vm2165_vm3, %vm2166_vm0  ;;  %v1949_v53 = vmul.f32 %v3939_v49, %v1948_v6  ;;  %v2184_v56 = vand.u32 2147483647, %v4443_v10  ;;  %v2186_v48 = vand.u32 2147483648, %v4443_v10 }
 0x406   : > { %v2162_v18 = vsub.f32 1.0, %v2161_v8  ;;  %vm2180_vm9 = vweird.f32 %v4443_v10 }
 0x407   : > { %v1953_v27 = vmul.f32 %v2785_v17, %v1952_v59  ;;  %vm4492_vm10 = vcmp.eq.f32.partialorder %v2184_v56, 8.507059e+37  ;;  %v2187_v28 = vor.u32 1.1754944e-38, %v2186_v48 }
 0x408   : > { %v2163_v3 = vmul.f32 %v2787_v15, %v2162_v18 }
 0x409   : > { %v1954_v54 = vadd.f32 %v2785_v17, %v1953_v27 }
 0x40a   : > { %v2164_v2 = vadd.f32 %v2787_v15, %v2163_v3  ;;  %v4469_v12 = vpop.eup %2788 }
 0x40b   : > { %v1958_v33 = vsel %vm1957_vm2, %v2785_v17, %v1954_v54  ;;  %v2176_v38 = vmul.f32 %v4469_v12, %v4443_v10  ;;  %vm2181_vm8 = vweird.f32 %v4469_v12 }
 0x40c   : > { %v1963_v24 = vsel %vm1960_vm5, %v1962_v11, %v1958_v33  ;;  %v2168_v36 = vsel %vm2167_vm6, %v2787_v15, %v2164_v2  ;;  %vm4498_vm12 = vmor %vm2180_vm9, %vm2181_vm8 }
 0x40d   : > { %v1964_v63 = vmul.f32 %v3943_v0, %v1963_v24  ;;  %v2173_v50 = vsel %vm2170_vm7, %v2172_v25, %v2168_v36  ;;  %v1720_v44 = vpop.xlane.xlu2 %1719  ;;  %v2177_v34 = vsub.f32 1.0, %v2176_v38 }
 0x40e   : > { %v2174_v58 = vmul.f32 %v3945_v40, %v2173_v50  ;;  %2790 = vrcp.f32 %v1720_v44  ;;  %v1974_v22 = vand.u32 2147483647, %v1720_v44  ;;  %v1976_v42 = vand.u32 2147483648, %v1720_v44 }
 0x40f   : > { %v2503_v14 = vpack.c.bf16 %v1964_v63, %v1949_v53  ;;  %v2178_v4 = vmul.f32 %v4469_v12, %v2177_v34  ;;  %vm1970_vm13 = vweird.f32 %v1720_v44 }
 0x410   : > { %v2538_v45 = vpack.c.bf16 %v2174_v58, %v2159_v39  ;;  %vm4502_vm14 = vcmp.eq.f32.partialorder %v1974_v22, 8.507059e+37  ;;  %v1977_v59 = vor.u32 1.1754944e-38, %v1976_v42 }
 0x411   : > { %2555 = vst [vmem:[%s4128_s18 + $0x30] sm:$0xff] %v2503_v14   ;;  %v2179_v29 = vadd.f32 %v4469_v12, %v2178_v4 }
 0x412   : > { %2562 = vst [vmem:[%s4128_s18 + $0x68] sm:$0xff] %v2538_v45   ;;  %v4479_v31 = vpop.xlane.xlu1 %1753 }
 0x413   : > { %2792 = vrcp.f32 %v4479_v31  ;;  %v2183_v35 = vsel %vm4498_vm12, %v4469_v12, %v2179_v29  ;;  %vm2225_vm1 = vweird.f32 %v4479_v31  ;;  %v2231_v50 = vand.u32 2147483648, %v4479_v31 }
 0x414   : > { %v2791_v49 = vpop.eup %2790  ;;  %v2188_v61 = vsel %vm4492_vm10, %v2187_v28, %v2183_v35  ;;  %v2229_v14 = vand.u32 2147483647, %v4479_v31 }
 0x415   : > { %v1966_v0 = vmul.f32 %v2791_v49, %v1720_v44  ;;  %v1722_v55 = vpop.xlane.xlu0 %1721  ;;  %vm1971_vm11 = vweird.f32 %v2791_v49  ;;  %v2189_v58 = vmul.f32 %v3949_v52, %v2188_v61 }
 0x416   : > { %v1750_v1 = vpop.xlane.xlu2 %1749  ;;  %2794 = vrcp.f32 %v1722_v55  ;;  %vm4510_vm15 = vmor %vm1970_vm13, %vm1971_vm11  ;;  %v1989_v47 = vand.u32 2147483647, %v1722_v55  ;;  %v1991_v46 = vand.u32 2147483648, %v1722_v55  ;;  %vm1985_vm3 = vweird.f32 %v1722_v55 }
 0x417   : > { %v1967_v40 = vsub.f32 1.0, %v1966_v0  ;;  %2796 = vrcp.f32 %v1750_v1  ;;  %v2199_v18 = vand.u32 2147483647, %v1750_v1  ;;  %v2201_v26 = vand.u32 2147483648, %v1750_v1 }
 0x418   : > { %vm2195_vm2 = vweird.f32 %v1750_v1  ;;  %vm1990_vm6 = vcmp.eq.f32.partialorder %v1989_v47, 8.507059e+37  ;;  %v1992_v2 = vor.u32 1.1754944e-38, %v1991_v46  ;;  %vm2230_vm12 = vcmp.eq.f32.partialorder %v2229_v14, 8.507059e+37 }
 0x419   : > { %v4484_v37 = vpop.eup %2792  ;;  %v1968_v43 = vmul.f32 %v2791_v49, %v1967_v40  ;;  %vm2200_vm9 = vcmp.eq.f32.partialorder %v2199_v18, 8.507059e+37  ;;  %v2202_v33 = vor.u32 1.1754944e-38, %v2201_v26 }
 0x41a   : > { %v2221_v57 = vmul.f32 %v4484_v37, %v4479_v31  ;;  %vm2226_vm7 = vweird.f32 %v4484_v37 }
 0x41b   : > { %v1969_v13 = vadd.f32 %v2791_v49, %v1968_v43  ;;  %vm4535_vm10 = vmor %vm2225_vm1, %vm2226_vm7  ;;  %v4746_v43 = vld [vmem:[#allocation6_spill] sm:$0xff] }
 0x41c   : > { %v2795_v30 = vpop.eup %2794  ;;  %v2222_v10 = vsub.f32 1.0, %v2221_v57 }
 0x41d   : > { %v2797_v15 = vpop.eup %2796  ;;  %v1981_v41 = vmul.f32 %v2795_v30, %v1722_v55  ;;  %v4496_v51 = vpop.xlane.xlu0 %1751  ;;  %v1973_v27 = vsel %vm4510_vm15, %v2791_v49, %v1969_v13  ;;  %vm1986_vm0 = vweird.f32 %v2795_v30  ;;  %v2232_v55 = vor.u32 1.1754944e-38, %v2231_v50 }
 0x41e   : > { %v2191_v16 = vmul.f32 %v2797_v15, %v1750_v1  ;;  %2798 = vrcp.f32 %v4496_v51  ;;  %v2223_v3 = vmul.f32 %v4484_v37, %v2222_v10  ;;  %vm2196_vm4 = vweird.f32 %v2797_v15  ;;  %vm1987_vm5 = vmor %vm1985_vm3, %vm1986_vm0 }
 0x41f   : > { %v1982_v32 = vsub.f32 1.0, %v1981_v41  ;;  %v1978_v6 = vsel %vm4502_vm14, %v1977_v59, %v1973_v27  ;;  %vm2197_vm8 = vmor %vm2195_vm2, %vm2196_vm4  ;;  %v2214_v49 = vand.u32 2147483647, %v4496_v51  ;;  %vm2210_vm13 = vweird.f32 %v4496_v51 }
 0x420   : > { %v2192_v62 = vsub.f32 1.0, %v2191_v16  ;;  %v2224_v12 = vadd.f32 %v4484_v37, %v2223_v3  ;;  %v1979_v63 = vmul.f32 %v3956_v7, %v1978_v6 }
 0x421   : > { %v1983_v21 = vmul.f32 %v2795_v30, %v1982_v32  ;;  %vm2215_vm15 = vcmp.eq.f32.partialorder %v2214_v49, 8.507059e+37 }
 0x422   : > { %v2193_v20 = vmul.f32 %v2797_v15, %v2192_v62  ;;  %v2228_v52 = vsel %vm4535_vm10, %v4484_v37, %v2224_v12  ;;  %v4745_v37 = vld [vmem:[#allocation5_spill] sm:$0xff] }
 0x423   : > { %v1984_v54 = vadd.f32 %v2795_v30, %v1983_v21  ;;  %v2233_v1 = vsel %vm2230_vm12, %v2232_v55, %v2228_v52 }
 0x424   : > { %v2194_v11 = vadd.f32 %v2797_v15, %v2193_v20  ;;  %v2799_v9 = vpop.eup %2798  ;;  %v2234_v48 = vmul.f32 %v4745_v37, %v2233_v1 }
 0x425   : > { %v1988_v25 = vsel %vm1987_vm5, %v2795_v30, %v1984_v54  ;;  %v2206_v53 = vmul.f32 %v2799_v9, %v4496_v51  ;;  %vm2211_vm11 = vweird.f32 %v2799_v9 }
 0x426   : > { %v2198_v24 = vsel %vm2197_vm8, %v2797_v15, %v2194_v11  ;;  %v1993_v36 = vsel %vm1990_vm6, %v1992_v2, %v1988_v25  ;;  %vm2212_vm14 = vmor %vm2210_vm13, %vm2211_vm11 }
 0x427   : > { %v2203_v44 = vsel %vm2200_vm9, %v2202_v33, %v2198_v24  ;;  %v1994_v39 = vmul.f32 %v3966_v19, %v1993_v36  ;;  %v2207_v45 = vsub.f32 1.0, %v2206_v53  ;;  %v2216_v19 = vand.u32 2147483648, %v4496_v51 }
 0x428   : > { %v2204_v38 = vmul.f32 %v3968_v5, %v2203_v44 }
 0x429   : > { %v2508_v34 = vpack.c.bf16 %v1994_v39, %v1979_v63  ;;  %v2208_v0 = vmul.f32 %v2799_v9, %v2207_v45  ;;  %v2217_v4 = vor.u32 1.1754944e-38, %v2216_v19 }
 0x42a   : > { %v2543_v5 = vpack.c.bf16 %v2204_v38, %v2189_v58 }
 0x42b   : > { %2556 = vst [vmem:[%s4128_s18 + $0x38] sm:$0xff] %v2508_v34   ;;  %v2209_v31 = vadd.f32 %v2799_v9, %v2208_v0 }
 0x42c   : > { %2563 = vst [vmem:[%s4128_s18 + $0x70] sm:$0xff] %v2543_v5  }
 0x42d   : > { %v2213_v40 = vsel %vm2212_vm14, %v2799_v9, %v2209_v31 }
 0x42e   : > { %v2218_v56 = vsel %vm2215_vm15, %v2217_v4, %v2213_v40 }
 0x42f   : > { %v2219_v22 = vmul.f32 %v4746_v43, %v2218_v56 }
 0x431   : > { %v2548_v57 = vpack.c.bf16 %v2234_v48, %v2219_v22 }
 0x433   : > { %2564 = vst [vmem:[%s4128_s18 + $0x78] sm:$0xff] %v2548_v57  }
 0x434   : > { %2827 = shalt.err (!%p2824_p3)
}
 0x435   : > { %s2868_s16 = smov 64   ;;  %s2869_s18 = smov 4  }
 0x436   : > { %2581 = dma.vmem_to_hbm [thread:$0]  (%p2948_p5), %s2313_s22, 2048, %s2315_s23, %s2300_s29, %s2868_s16, %s2868_s16, %s2869_s18  }
 0x437 PF: > { %p2587_p4 = scmp.ge.s32.totalorder %s2862_s27, 2  ;;  %s2329_s20 = sand.u32 1, %s2850_s24  }
 0x438   : > { %s2330_s21 = scalar_lea.sflag [#allocation3], %s2329_s20 }
 0x439   : > { %p2584_p7 = pnand %p2587_p4, %p2952_p6 }
 0x43b   : > { %p2585_p8 = pneg %p2584_p7 }
 0x43d   : > { %2845 = dma.done.wait (%p2585_p8), %s2330_s21, 2048  }
 0x43e   : > { %2847 = vsyncadd (%p2585_p8), %s2330_s21, 4294965248  ;;  %p17_p9 = scmp.ge.s32.totalorder %s2935_s30, 4   ;;  %s4747_s24 = smov %s2854_s25 }
 0x43f   : > { %s4748_s25 = smov %s2858_s26  ;;  %s4749_s26 = smov %s2946_s10 }
 0x440   : > { %s4750_s27 = smov %s2935_s30  ;;  %19 = sbr.rel (!%p17_p9) target bundleno = 3 (0x3), region = 83 }
 0x445   :  { %2336 = vsyncpa [#allocation3], 1 }
 0x446   :  { %2338 = vsyncpa [#allocation3 + $0x1], 1 }

</bundles_post_ra>
